<compile_context>
chip_gen: v6e
topology: v6e:2x2x1
jax: 0.10.0
libtpu: 0.0.40
codegen_flags: <defaults>
</compile_context>

<pallas_src>
import functools

import jax
import jax.numpy as jnp
from jax import lax
from jax.experimental import pallas as pl
from jax.experimental.pallas import tpu as pltpu


def _selective_scan_kernel(u_ref, dt_ref, at_ref, b_ref, c_ref, dp_ref, t_ref,
                           o_ref, carry_s_ref, carry_h_ref, *, n_state, group):
    """One (batch, D-chunk, L-chunk) grid step.

    u_ref, dt_ref : (1, Lc, Dc)
    at_ref        : (N, Dc)      A^T slice, grid-invariant along batch/L
    b_ref, c_ref  : (1, Lc, N)
    dp_ref        : (1, Dc)      skip connection
    t_ref         : (Lc, Lc)     lower-triangular ones (inclusive prefix-sum op)
    o_ref         : (1, Lc, Dc)
    carry_s_ref   : (1, N*Dc) VMEM scratch -- running cumsum of A_delta (shifted)
    carry_h_ref   : (1, N*Dc) VMEM scratch -- running cumsum of h
    """
    f32 = jnp.float32
    lc = pl.program_id(2)

    @pl.when(lc == 0)
    def _():
        carry_s_ref[...] = jnp.zeros_like(carry_s_ref)
        carry_h_ref[...] = jnp.zeros_like(carry_h_ref)

    u = u_ref[0].astype(f32)       # (Lc, Dc)
    dt = dt_ref[0].astype(f32)     # (Lc, Dc)
    bm = b_ref[0].astype(f32)      # (Lc, N)
    cm = c_ref[0].astype(f32)      # (Lc, N)
    dp = dp_ref[...].astype(f32)   # (1, Dc)
    T = t_ref[...]                 # (Lc, Lc)

    Lc, Dc = u.shape

    du = dt * u                    # (Lc, Dc), computed once per chunk

    # Reference zeroes A_delta at the very first sequence position (the F.pad
    # shift).  Implement it by zeroing the first column of the prefix-sum
    # operator on the first L-chunk only: one cheap (Lc, Lc) mask per chunk.
    col = lax.broadcasted_iota(jnp.int32, (1, Lc), 1)
    first_mask = jnp.where(jnp.logical_or(col > 0, lc > 0), 1.0, 0.0).astype(f32)
    t_a = T * first_mask           # used for the A_delta cumsum only

    y_acc = jnp.zeros((Lc, Dc), f32)

    num_groups = n_state // group
    for g in range(num_groups):    # static loop: num_groups is small (<= N/G)
        n0 = g * group
        lo, hi = n0 * Dc, (n0 + group) * Dc

        # ---- grouped A_delta: one wide triangular matmul for `group` states
        if group == 1:
            ad = jnp.exp(dt * at_ref[n0:n0 + 1, :])                 # (Lc, Dc)
        else:
            ad = jnp.concatenate(
                [jnp.exp(dt * at_ref[n0 + j:n0 + j + 1, :]) for j in range(group)],
                axis=1)                                             # (Lc, G*Dc)

        s = carry_s_ref[:, lo:hi] + jnp.dot(t_a, ad, preferred_element_type=f32)
        acum = jnp.exp(s)                                           # (Lc, G*Dc)

        # acum = exp(s) >= 1 (s >= 0), so the reference's +1e-12 is a no-op in
        # f32; take the divide off the EUP: approx reciprocal + 1 Newton step.
        inv = pl.reciprocal(acum, approx=True)
        inv = inv * (2.0 - acum * inv)

        # ---- grouped dt*u*B -> second wide triangular matmul ---------------
        if group == 1:
            bdu = du * bm[:, n0:n0 + 1]
        else:
            bdu = jnp.concatenate(
                [du * bm[:, n0 + j:n0 + j + 1] for j in range(group)], axis=1)
        h = bdu * inv                                               # (Lc, G*Dc)
        h_cum = carry_h_ref[:, lo:hi] + jnp.dot(T, h, preferred_element_type=f32)

        ya = h_cum * acum                                           # (Lc, G*Dc)
        for j in range(group):
            y_acc = y_acc + ya[:, j * Dc:(j + 1) * Dc] * cm[:, n0 + j:n0 + j + 1]

        # Batched carry update: one lane-dense row store per matmul result
        # instead of per-state single-sublane masked stores.
        carry_s_ref[:, lo:hi] = s[Lc - 1:Lc, :]
        carry_h_ref[:, lo:hi] = h_cum[Lc - 1:Lc, :]

    o_ref[0] = (y_acc + u * dp).astype(o_ref.dtype)


def _pick_block(dim, candidates):
    for c in candidates:
        if dim % c == 0:
            return c
    return dim


def _l_candidates():
    """Generation-dependent Lc: 128 on v5e (128-wide f32-only MXU), else 256."""
    try:
        kind = jax.devices()[0].device_kind.lower()
    except Exception:
        kind = ""
    if "v5 lite" in kind or "v5e" in kind or "v5lite" in kind:
        return (128, 64, 32, 16, 8)
    return (256, 128, 64, 32, 16, 8)


def _pick_group(n_state, dc, max_lanes=2048):
    """Largest divisor G of N with G*Dc <= max_lanes (keeps grouped temps ~2 MiB)."""
    g = 1
    for cand in range(1, n_state + 1):
        if n_state % cand == 0 and cand * dc <= max_lanes:
            g = cand
    return g


def selective_scan(u, dt, A, B, C, Dskip, *, chunk_l=None, chunk_d=None, group=None):
    Bb, L, D = u.shape
    N = A.shape[1]

    Lc = chunk_l if chunk_l is not None else _pick_block(L, _l_candidates())
    Dc = chunk_d if chunk_d is not None else _pick_block(D, (1024, 512, 256, 128))
    # v7x has 2 TensorCores: ensure there are >= 2 shardable "parallel" blocks.
    if chunk_d is None and Bb * (D // Dc) < 2 and Dc % 2 == 0 and (Dc // 2) % 128 == 0:
        Dc //= 2
    assert L % Lc == 0 and D % Dc == 0, "L/D must be divisible by chosen chunks"
    n_lc = L // Lc
    n_dc = D // Dc

    G = group if group is not None else _pick_group(N, Dc)
    assert N % G == 0, "group must divide the state dim"

    # Small, grid-invariant operands are prepared once on the host side; the
    # big tensors (u, dt, B, C) are passed through in their native dtype (the
    # kernel casts tiles to f32 in VMEM) -- no extra full-HBM astype pass.
    a_t = jnp.transpose(jnp.asarray(A, jnp.float32))        # (N, D)
    dp2 = jnp.asarray(Dskip, jnp.float32).reshape(1, D)      # (1, D)
    tri = jnp.tril(jnp.ones((Lc, Lc), jnp.float32))          # prefix-sum operator

    kernel = functools.partial(_selective_scan_kernel, n_state=N, group=G)

    return pl.pallas_call(
        kernel,
        out_shape=jax.ShapeDtypeStruct((Bb, L, D), jnp.float32),
        grid_spec=pltpu.PrefetchScalarGridSpec(
            num_scalar_prefetch=0,
            grid=(Bb, n_dc, n_lc),
            in_specs=[
                pl.BlockSpec((1, Lc, Dc), lambda b, d, c: (b, c, d)),   # u
                pl.BlockSpec((1, Lc, Dc), lambda b, d, c: (b, c, d)),   # dt
                pl.BlockSpec((N, Dc), lambda b, d, c: (0, d)),          # A^T
                pl.BlockSpec((1, Lc, N), lambda b, d, c: (b, c, 0)),    # B
                pl.BlockSpec((1, Lc, N), lambda b, d, c: (b, c, 0)),    # C
                pl.BlockSpec((1, Dc), lambda b, d, c: (0, d)),          # D skip
                pl.BlockSpec((Lc, Lc), lambda b, d, c: (0, 0)),         # tri
            ],
            out_specs=pl.BlockSpec((1, Lc, Dc), lambda b, d, c: (b, c, d)),
            scratch_shapes=[
                pltpu.VMEM((1, N * Dc), jnp.float32),   # carry: cumsum of A_delta
                pltpu.VMEM((1, N * Dc), jnp.float32),   # carry: cumsum of h
            ],
        ),
        compiler_params=pltpu.CompilerParams(
            dimension_semantics=("parallel", "parallel", "arbitrary"),
            vmem_limit_bytes=32 * 1024 * 1024,
        ),
    )(u, dt, a_t, B, C, dp2, tri)


def selective_scan_ref(u, dt, A, B, C, Dp):
    """Pure-JAX reference matching the PyTorch module semantics."""
    A_delta = jnp.maximum(jnp.exp(jnp.einsum('bld,dn->bldn', dt, A)), -20.0)
    B_delta_u = jnp.einsum('bld,bld,bln->bldn', dt, u, B)
    A_shift = A_delta.at[:, 0].set(0.0)   # == F.pad(A_delta[:,1:], (0,0,0,0,1,0))
    A_delta_cumsum = jnp.exp(jnp.cumsum(A_shift, axis=1))
    h_t = B_delta_u / (A_delta_cumsum + 1e-12)
    y = jnp.einsum('bldn,bln->bld', jnp.cumsum(h_t, axis=1) * A_delta_cumsum, C)
    return y + u * Dp[None, None, :]


if __name__ == "__main__":
    batch, L, dim, state = 2, 16, 32, 16

    key = jax.random.PRNGKey(0)
    k_u, k_dt, k_A, k_B, k_C, k_D = jax.random.split(key, 6)

    # Keep exp(cumsum(exp(dt*A))) well inside f32 range: dt bounded away from 0
    # and A bounded away from 0 so exp(dt*A) stays well below 1.
    u = jax.random.normal(k_u, (batch, L, dim), jnp.float32)
    dt = 0.5 + 0.5 * jnp.abs(jax.random.normal(k_dt, (batch, L, dim), jnp.float32))
    A = -(1.5 + jnp.abs(jax.random.normal(k_A, (dim, state), jnp.float32)))
    B = 0.1 * jax.random.normal(k_B, (batch, L, state), jnp.float32)
    C = 0.1 * jax.random.normal(k_C, (batch, L, state), jnp.float32)
    Dp = jax.random.normal(k_D, (dim,), jnp.float32)

    # chunk_l=8 -> two L-chunks, exercising the carried (cross-chunk) scan;
    # the grouped-matmul path is exercised with G = N = 16 at this tiny Dc.
    out = jax.block_until_ready(selective_scan(u, dt, A, B, C, Dp, chunk_l=8))
    ref = jax.block_until_ready(selective_scan_ref(u, dt, A, B, C, Dp))

    assert out.shape == (batch, L, dim)
    assert jnp.allclose(out, ref, rtol=2e-3, atol=2e-3), "mismatch vs reference"

    print("KERNEL_OK")
</pallas_src>

<mosaic_0001>
module attributes {stable_mosaic.version = 11 : i64} {
  func.func @_selective_scan_kernel(%arg0: i32, %arg1: i32, %arg2: i32, %arg3: memref<1x8x32xf32, #tpu.memory_space<vmem>>, %arg4: memref<1x8x32xf32, #tpu.memory_space<vmem>>, %arg5: memref<16x32xf32, #tpu.memory_space<vmem>>, %arg6: memref<1x8x16xf32, #tpu.memory_space<vmem>>, %arg7: memref<1x8x16xf32, #tpu.memory_space<vmem>>, %arg8: memref<1x32xf32, #tpu.memory_space<vmem>>, %arg9: memref<8x8xf32, #tpu.memory_space<vmem>>, %arg10: memref<1x8x32xf32, #tpu.memory_space<vmem>>, %arg11: memref<1x512xf32, #tpu.memory_space<vmem>>, %arg12: memref<1x512xf32, #tpu.memory_space<vmem>>) attributes {dimension_semantics = [#tpu.dimension_semantics<parallel>, #tpu.dimension_semantics<parallel>, #tpu.dimension_semantics<arbitrary>], iteration_bounds = array<i64: 2, 1, 2>, scalar_prefetch = 0 : i64, scratch_operands = 2 : i64, tpu.core_type = #tpu.core_type<tc>, window_params = [{transform_indices = @transform_0, window_bounds = array<i64: 1, 8, 32>}, {transform_indices = @transform_1, window_bounds = array<i64: 1, 8, 32>}, {transform_indices = @transform_2, window_bounds = array<i64: 16, 32>}, {transform_indices = @transform_3, window_bounds = array<i64: 1, 8, 16>}, {transform_indices = @transform_4, window_bounds = array<i64: 1, 8, 16>}, {transform_indices = @transform_5, window_bounds = array<i64: 1, 32>}, {pipeline_mode = #tpu.pipeline_mode<synchronous>, transform_indices = @transform_6, window_bounds = array<i64: 8, 8>}, {transform_indices = @transform_7, window_bounds = array<i64: 1, 8, 32>}]} {
    %c0_i32 = arith.constant 0 : i32
    %0 = arith.cmpi eq, %arg2, %c0_i32 : i32
    %1 = arith.extui %0 : i1 to i32
    %c0_i32_0 = arith.constant 0 : i32
    %2 = arith.cmpi ne, %1, %c0_i32_0 : i32
    scf.if %2 {
      %cst_51 = arith.constant 0.000000e+00 : f32
      %246 = vector.broadcast %cst_51 : f32 to vector<1x512xf32>
      %c0_52 = arith.constant 0 : index
      %c0_53 = arith.constant 0 : index
      %247 = vector.load %arg11[%c0_52, %c0_53] : memref<1x512xf32, #tpu.memory_space<vmem>>, vector<1x512xf32>
      tpu.vector_store %arg11[%c0_52, %c0_53], %246 {strides = array<i32>} : memref<1x512xf32, #tpu.memory_space<vmem>>, vector<1x512xf32>,
      %cst_54 = arith.constant 0.000000e+00 : f32
      %248 = vector.broadcast %cst_54 : f32 to vector<1x512xf32>
      %c0_55 = arith.constant 0 : index
      %c0_56 = arith.constant 0 : index
      %249 = vector.load %arg12[%c0_55, %c0_56] : memref<1x512xf32, #tpu.memory_space<vmem>>, vector<1x512xf32>
      tpu.vector_store %arg12[%c0_55, %c0_56], %248 {strides = array<i32>} : memref<1x512xf32, #tpu.memory_space<vmem>>, vector<1x512xf32>,
    } else {
    }
    %c0 = arith.constant 0 : index
    %c0_1 = arith.constant 0 : index
    %c0_2 = arith.constant 0 : index
    %3 = vector.load %arg3[%c0, %c0_1, %c0_2] : memref<1x8x32xf32, #tpu.memory_space<vmem>>, vector<1x8x32xf32>
    %4 = vector.shape_cast %3 : vector<1x8x32xf32> to vector<8x32xf32>
    %c0_3 = arith.constant 0 : index
    %c0_4 = arith.constant 0 : index
    %c0_5 = arith.constant 0 : index
    %5 = vector.load %arg4[%c0_3, %c0_4, %c0_5] : memref<1x8x32xf32, #tpu.memory_space<vmem>>, vector<1x8x32xf32>
    %6 = vector.shape_cast %5 : vector<1x8x32xf32> to vector<8x32xf32>
    %c0_6 = arith.constant 0 : index
    %c0_7 = arith.constant 0 : index
    %c0_8 = arith.constant 0 : index
    %7 = vector.load %arg6[%c0_6, %c0_7, %c0_8] : memref<1x8x16xf32, #tpu.memory_space<vmem>>, vector<1x8x16xf32>
    %8 = vector.shape_cast %7 : vector<1x8x16xf32> to vector<8x16xf32>
    %c0_9 = arith.constant 0 : index
    %c0_10 = arith.constant 0 : index
    %c0_11 = arith.constant 0 : index
    %9 = vector.load %arg7[%c0_9, %c0_10, %c0_11] : memref<1x8x16xf32, #tpu.memory_space<vmem>>, vector<1x8x16xf32>
    %10 = vector.shape_cast %9 : vector<1x8x16xf32> to vector<8x16xf32>
    %c0_12 = arith.constant 0 : index
    %c0_13 = arith.constant 0 : index
    %11 = vector.load %arg8[%c0_12, %c0_13] : memref<1x32xf32, #tpu.memory_space<vmem>>, vector<1x32xf32>
    %c0_14 = arith.constant 0 : index
    %c0_15 = arith.constant 0 : index
    %12 = vector.load %arg9[%c0_14, %c0_15] : memref<8x8xf32, #tpu.memory_space<vmem>>, vector<8x8xf32>
    %13 = arith.mulf %6, %4 : vector<8x32xf32>
    %14 = tpu.iota {dimensions = array<i32: 1>} : vector<1x8xi32>
    %c0_i32_16 = arith.constant 0 : i32
    %15 = vector.broadcast %c0_i32_16 : i32 to vector<1x8xi32>
    %16 = arith.cmpi sgt, %14, %15 : vector<1x8xi32>
    %c0_i32_17 = arith.constant 0 : i32
    %17 = arith.cmpi sgt, %arg2, %c0_i32_17 : i32
    %18 = vector.broadcast %17 : i1 to vector<1x8xi1>
    %19 = arith.ori %16, %18 : vector<1x8xi1>
    %cst = arith.constant 1.000000e+00 : f32
    %cst_18 = arith.constant 0.000000e+00 : f32
    %20 = vector.broadcast %cst : f32 to vector<1x8xf32>
    %21 = vector.broadcast %cst_18 : f32 to vector<1x8xf32>
    %22 = arith.select %19, %20, %21 : vector<1x8xi1>, vector<1x8xf32>
    %23 = vector.broadcast %22 : vector<1x8xf32> to vector<8x8xf32>
    %24 = arith.mulf %12, %23 : vector<8x8xf32>
    %cst_19 = arith.constant 0.000000e+00 : f32
    %25 = vector.broadcast %cst_19 : f32 to vector<8x32xf32>
    %c0_20 = arith.constant 0 : index
    %c0_21 = arith.constant 0 : index
    %26 = vector.load %arg5[%c0_20, %c0_21] : memref<16x32xf32, #tpu.memory_space<vmem>>, vector<1x32xf32>
    %27 = vector.broadcast %26 : vector<1x32xf32> to vector<8x32xf32>
    %28 = arith.mulf %6, %27 : vector<8x32xf32>
    %29 = math.exp %28 : vector<8x32xf32>
    %c1 = arith.constant 1 : index
    %c0_22 = arith.constant 0 : index
    %30 = vector.load %arg5[%c1, %c0_22] : memref<16x32xf32, #tpu.memory_space<vmem>>, vector<1x32xf32>
    %31 = vector.broadcast %30 : vector<1x32xf32> to vector<8x32xf32>
    %32 = arith.mulf %6, %31 : vector<8x32xf32>
    %33 = math.exp %32 : vector<8x32xf32>
    %c2 = arith.constant 2 : index
    %c0_23 = arith.constant 0 : index
    %34 = vector.load %arg5[%c2, %c0_23] : memref<16x32xf32, #tpu.memory_space<vmem>>, vector<1x32xf32>
    %35 = vector.broadcast %34 : vector<1x32xf32> to vector<8x32xf32>
    %36 = arith.mulf %6, %35 : vector<8x32xf32>
    %37 = math.exp %36 : vector<8x32xf32>
    %c3 = arith.constant 3 : index
    %c0_24 = arith.constant 0 : index
    %38 = vector.load %arg5[%c3, %c0_24] : memref<16x32xf32, #tpu.memory_space<vmem>>, vector<1x32xf32>
    %39 = vector.broadcast %38 : vector<1x32xf32> to vector<8x32xf32>
    %40 = arith.mulf %6, %39 : vector<8x32xf32>
    %41 = math.exp %40 : vector<8x32xf32>
    %c4 = arith.constant 4 : index
    %c0_25 = arith.constant 0 : index
    %42 = vector.load %arg5[%c4, %c0_25] : memref<16x32xf32, #tpu.memory_space<vmem>>, vector<1x32xf32>
    %43 = vector.broadcast %42 : vector<1x32xf32> to vector<8x32xf32>
    %44 = arith.mulf %6, %43 : vector<8x32xf32>
    %45 = math.exp %44 : vector<8x32xf32>
    %c5 = arith.constant 5 : index
    %c0_26 = arith.constant 0 : index
    %46 = vector.load %arg5[%c5, %c0_26] : memref<16x32xf32, #tpu.memory_space<vmem>>, vector<1x32xf32>
    %47 = vector.broadcast %46 : vector<1x32xf32> to vector<8x32xf32>
    %48 = arith.mulf %6, %47 : vector<8x32xf32>
    %49 = math.exp %48 : vector<8x32xf32>
    %c6 = arith.constant 6 : index
    %c0_27 = arith.constant 0 : index
    %50 = vector.load %arg5[%c6, %c0_27] : memref<16x32xf32, #tpu.memory_space<vmem>>, vector<1x32xf32>
    %51 = vector.broadcast %50 : vector<1x32xf32> to vector<8x32xf32>
    %52 = arith.mulf %6, %51 : vector<8x32xf32>
    %53 = math.exp %52 : vector<8x32xf32>
    %c7 = arith.constant 7 : index
    %c0_28 = arith.constant 0 : index
    %54 = vector.load %arg5[%c7, %c0_28] : memref<16x32xf32, #tpu.memory_space<vmem>>, vector<1x32xf32>
    %55 = vector.broadcast %54 : vector<1x32xf32> to vector<8x32xf32>
    %56 = arith.mulf %6, %55 : vector<8x32xf32>
    %57 = math.exp %56 : vector<8x32xf32>
    %c8 = arith.constant 8 : index
    %c0_29 = arith.constant 0 : index
    %58 = vector.load %arg5[%c8, %c0_29] : memref<16x32xf32, #tpu.memory_space<vmem>>, vector<1x32xf32>
    %59 = vector.broadcast %58 : vector<1x32xf32> to vector<8x32xf32>
    %60 = arith.mulf %6, %59 : vector<8x32xf32>
    %61 = math.exp %60 : vector<8x32xf32>
    %c9 = arith.constant 9 : index
    %c0_30 = arith.constant 0 : index
    %62 = vector.load %arg5[%c9, %c0_30] : memref<16x32xf32, #tpu.memory_space<vmem>>, vector<1x32xf32>
    %63 = vector.broadcast %62 : vector<1x32xf32> to vector<8x32xf32>
    %64 = arith.mulf %6, %63 : vector<8x32xf32>
    %65 = math.exp %64 : vector<8x32xf32>
    %c10 = arith.constant 10 : index
    %c0_31 = arith.constant 0 : index
    %66 = vector.load %arg5[%c10, %c0_31] : memref<16x32xf32, #tpu.memory_space<vmem>>, vector<1x32xf32>
    %67 = vector.broadcast %66 : vector<1x32xf32> to vector<8x32xf32>
    %68 = arith.mulf %6, %67 : vector<8x32xf32>
    %69 = math.exp %68 : vector<8x32xf32>
    %c11 = arith.constant 11 : index
    %c0_32 = arith.constant 0 : index
    %70 = vector.load %arg5[%c11, %c0_32] : memref<16x32xf32, #tpu.memory_space<vmem>>, vector<1x32xf32>
    %71 = vector.broadcast %70 : vector<1x32xf32> to vector<8x32xf32>
    %72 = arith.mulf %6, %71 : vector<8x32xf32>
    %73 = math.exp %72 : vector<8x32xf32>
    %c12 = arith.constant 12 : index
    %c0_33 = arith.constant 0 : index
    %74 = vector.load %arg5[%c12, %c0_33] : memref<16x32xf32, #tpu.memory_space<vmem>>, vector<1x32xf32>
    %75 = vector.broadcast %74 : vector<1x32xf32> to vector<8x32xf32>
    %76 = arith.mulf %6, %75 : vector<8x32xf32>
    %77 = math.exp %76 : vector<8x32xf32>
    %c13 = arith.constant 13 : index
    %c0_34 = arith.constant 0 : index
    %78 = vector.load %arg5[%c13, %c0_34] : memref<16x32xf32, #tpu.memory_space<vmem>>, vector<1x32xf32>
    %79 = vector.broadcast %78 : vector<1x32xf32> to vector<8x32xf32>
    %80 = arith.mulf %6, %79 : vector<8x32xf32>
    %81 = math.exp %80 : vector<8x32xf32>
    %c14 = arith.constant 14 : index
    %c0_35 = arith.constant 0 : index
    %82 = vector.load %arg5[%c14, %c0_35] : memref<16x32xf32, #tpu.memory_space<vmem>>, vector<1x32xf32>
    %83 = vector.broadcast %82 : vector<1x32xf32> to vector<8x32xf32>
    %84 = arith.mulf %6, %83 : vector<8x32xf32>
    %85 = math.exp %84 : vector<8x32xf32>
    %c15 = arith.constant 15 : index
    %c0_36 = arith.constant 0 : index
    %86 = vector.load %arg5[%c15, %c0_36] : memref<16x32xf32, #tpu.memory_space<vmem>>, vector<1x32xf32>
    %87 = vector.broadcast %86 : vector<1x32xf32> to vector<8x32xf32>
    %88 = arith.mulf %6, %87 : vector<8x32xf32>
    %89 = math.exp %88 : vector<8x32xf32>
    %90 = tpu.concatenate %29, %33, %37, %41, %45, %49, %53, %57, %61, %65, %69, %73, %77, %81, %85, %89 in 1 : vector<8x32xf32>, vector<8x32xf32>, vector<8x32xf32>, vector<8x32xf32>, vector<8x32xf32>, vector<8x32xf32>, vector<8x32xf32>, vector<8x32xf32>, vector<8x32xf32>, vector<8x32xf32>, vector<8x32xf32>, vector<8x32xf32>, vector<8x32xf32>, vector<8x32xf32>, vector<8x32xf32>, vector<8x32xf32> -> vector<8x512xf32>
    %c0_37 = arith.constant 0 : index
    %c0_38 = arith.constant 0 : index
    %91 = vector.load %arg11[%c0_37, %c0_38] : memref<1x512xf32, #tpu.memory_space<vmem>>, vector<1x512xf32>
    %cst_39 = arith.constant dense<0.000000e+00> : vector<8x512xf32>
    %92 = tpu.matmul %24, %90, %cst_39 {dimension_numbers = #tpu.dot_dimension_numbers<[1], [0], [0], [1], [0, 0, 1, 1], [], []>} : vector<8x8xf32>, vector<8x512xf32>, vector<8x512xf32> -> vector<8x512xf32>
    %93 = vector.broadcast %91 : vector<1x512xf32> to vector<8x512xf32>
    %94 = arith.addf %93, %92 : vector<8x512xf32>
    %95 = math.exp %94 : vector<8x512xf32>
    %96 = tpu.reciprocal %95 {approx = true} : vector<8x512xf32> -> vector<8x512xf32>
    %97 = arith.mulf %95, %96 : vector<8x512xf32>
    %cst_40 = arith.constant 2.000000e+00 : f32
    %98 = vector.broadcast %cst_40 : f32 to vector<8x512xf32>
    %99 = arith.subf %98, %97 : vector<8x512xf32>
    %100 = arith.mulf %96, %99 : vector<8x512xf32>
    %101 = vector.extract_strided_slice %8 {offsets = [0, 0], sizes = [8, 1], strides = [1, 1]} : vector<8x16xf32> to vector<8x1xf32>
    %102 = vector.broadcast %101 : vector<8x1xf32> to vector<8x32xf32>
    %103 = arith.mulf %13, %102 : vector<8x32xf32>
    %104 = vector.extract_strided_slice %8 {offsets = [0, 1], sizes = [8, 1], strides = [1, 1]} : vector<8x16xf32> to vector<8x1xf32>
    %105 = vector.broadcast %104 : vector<8x1xf32> to vector<8x32xf32>
    %106 = arith.mulf %13, %105 : vector<8x32xf32>
    %107 = vector.extract_strided_slice %8 {offsets = [0, 2], sizes = [8, 1], strides = [1, 1]} : vector<8x16xf32> to vector<8x1xf32>
    %108 = vector.broadcast %107 : vector<8x1xf32> to vector<8x32xf32>
    %109 = arith.mulf %13, %108 : vector<8x32xf32>
    %110 = vector.extract_strided_slice %8 {offsets = [0, 3], sizes = [8, 1], strides = [1, 1]} : vector<8x16xf32> to vector<8x1xf32>
    %111 = vector.broadcast %110 : vector<8x1xf32> to vector<8x32xf32>
    %112 = arith.mulf %13, %111 : vector<8x32xf32>
    %113 = vector.extract_strided_slice %8 {offsets = [0, 4], sizes = [8, 1], strides = [1, 1]} : vector<8x16xf32> to vector<8x1xf32>
    %114 = vector.broadcast %113 : vector<8x1xf32> to vector<8x32xf32>
    %115 = arith.mulf %13, %114 : vector<8x32xf32>
    %116 = vector.extract_strided_slice %8 {offsets = [0, 5], sizes = [8, 1], strides = [1, 1]} : vector<8x16xf32> to vector<8x1xf32>
    %117 = vector.broadcast %116 : vector<8x1xf32> to vector<8x32xf32>
    %118 = arith.mulf %13, %117 : vector<8x32xf32>
    %119 = vector.extract_strided_slice %8 {offsets = [0, 6], sizes = [8, 1], strides = [1, 1]} : vector<8x16xf32> to vector<8x1xf32>
    %120 = vector.broadcast %119 : vector<8x1xf32> to vector<8x32xf32>
    %121 = arith.mulf %13, %120 : vector<8x32xf32>
    %122 = vector.extract_strided_slice %8 {offsets = [0, 7], sizes = [8, 1], strides = [1, 1]} : vector<8x16xf32> to vector<8x1xf32>
    %123 = vector.broadcast %122 : vector<8x1xf32> to vector<8x32xf32>
    %124 = arith.mulf %13, %123 : vector<8x32xf32>
    %125 = vector.extract_strided_slice %8 {offsets = [0, 8], sizes = [8, 1], strides = [1, 1]} : vector<8x16xf32> to vector<8x1xf32>
    %126 = vector.broadcast %125 : vector<8x1xf32> to vector<8x32xf32>
    %127 = arith.mulf %13, %126 : vector<8x32xf32>
    %128 = vector.extract_strided_slice %8 {offsets = [0, 9], sizes = [8, 1], strides = [1, 1]} : vector<8x16xf32> to vector<8x1xf32>
    %129 = vector.broadcast %128 : vector<8x1xf32> to vector<8x32xf32>
    %130 = arith.mulf %13, %129 : vector<8x32xf32>
    %131 = vector.extract_strided_slice %8 {offsets = [0, 10], sizes = [8, 1], strides = [1, 1]} : vector<8x16xf32> to vector<8x1xf32>
    %132 = vector.broadcast %131 : vector<8x1xf32> to vector<8x32xf32>
    %133 = arith.mulf %13, %132 : vector<8x32xf32>
    %134 = vector.extract_strided_slice %8 {offsets = [0, 11], sizes = [8, 1], strides = [1, 1]} : vector<8x16xf32> to vector<8x1xf32>
    %135 = vector.broadcast %134 : vector<8x1xf32> to vector<8x32xf32>
    %136 = arith.mulf %13, %135 : vector<8x32xf32>
    %137 = vector.extract_strided_slice %8 {offsets = [0, 12], sizes = [8, 1], strides = [1, 1]} : vector<8x16xf32> to vector<8x1xf32>
    %138 = vector.broadcast %137 : vector<8x1xf32> to vector<8x32xf32>
    %139 = arith.mulf %13, %138 : vector<8x32xf32>
    %140 = vector.extract_strided_slice %8 {offsets = [0, 13], sizes = [8, 1], strides = [1, 1]} : vector<8x16xf32> to vector<8x1xf32>
    %141 = vector.broadcast %140 : vector<8x1xf32> to vector<8x32xf32>
    %142 = arith.mulf %13, %141 : vector<8x32xf32>
    %143 = vector.extract_strided_slice %8 {offsets = [0, 14], sizes = [8, 1], strides = [1, 1]} : vector<8x16xf32> to vector<8x1xf32>
    %144 = vector.broadcast %143 : vector<8x1xf32> to vector<8x32xf32>
    %145 = arith.mulf %13, %144 : vector<8x32xf32>
    %146 = vector.extract_strided_slice %8 {offsets = [0, 15], sizes = [8, 1], strides = [1, 1]} : vector<8x16xf32> to vector<8x1xf32>
    %147 = vector.broadcast %146 : vector<8x1xf32> to vector<8x32xf32>
    %148 = arith.mulf %13, %147 : vector<8x32xf32>
    %149 = tpu.concatenate %103, %106, %109, %112, %115, %118, %121, %124, %127, %130, %133, %136, %139, %142, %145, %148 in 1 : vector<8x32xf32>, vector<8x32xf32>, vector<8x32xf32>, vector<8x32xf32>, vector<8x32xf32>, vector<8x32xf32>, vector<8x32xf32>, vector<8x32xf32>, vector<8x32xf32>, vector<8x32xf32>, vector<8x32xf32>, vector<8x32xf32>, vector<8x32xf32>, vector<8x32xf32>, vector<8x32xf32>, vector<8x32xf32> -> vector<8x512xf32>
    %150 = arith.mulf %149, %100 : vector<8x512xf32>
    %c0_41 = arith.constant 0 : index
    %c0_42 = arith.constant 0 : index
    %151 = vector.load %arg12[%c0_41, %c0_42] : memref<1x512xf32, #tpu.memory_space<vmem>>, vector<1x512xf32>
    %cst_43 = arith.constant dense<0.000000e+00> : vector<8x512xf32>
    %152 = tpu.matmul %12, %150, %cst_43 {dimension_numbers = #tpu.dot_dimension_numbers<[1], [0], [0], [1], [0, 0, 1, 1], [], []>} : vector<8x8xf32>, vector<8x512xf32>, vector<8x512xf32> -> vector<8x512xf32>
    %153 = vector.broadcast %151 : vector<1x512xf32> to vector<8x512xf32>
    %154 = arith.addf %153, %152 : vector<8x512xf32>
    %155 = arith.mulf %154, %95 : vector<8x512xf32>
    %156 = vector.extract_strided_slice %155 {offsets = [0, 0], sizes = [8, 32], strides = [1, 1]} : vector<8x512xf32> to vector<8x32xf32>
    %157 = vector.extract_strided_slice %10 {offsets = [0, 0], sizes = [8, 1], strides = [1, 1]} : vector<8x16xf32> to vector<8x1xf32>
    %158 = vector.broadcast %157 : vector<8x1xf32> to vector<8x32xf32>
    %159 = arith.mulf %156, %158 : vector<8x32xf32>
    %160 = arith.addf %25, %159 : vector<8x32xf32>
    %161 = vector.extract_strided_slice %155 {offsets = [0, 32], sizes = [8, 32], strides = [1, 1]} : vector<8x512xf32> to vector<8x32xf32>
    %162 = vector.extract_strided_slice %10 {offsets = [0, 1], sizes = [8, 1], strides = [1, 1]} : vector<8x16xf32> to vector<8x1xf32>
    %163 = vector.broadcast %162 : vector<8x1xf32> to vector<8x32xf32>
    %164 = arith.mulf %161, %163 : vector<8x32xf32>
    %165 = arith.addf %160, %164 : vector<8x32xf32>
    %166 = vector.extract_strided_slice %155 {offsets = [0, 64], sizes = [8, 32], strides = [1, 1]} : vector<8x512xf32> to vector<8x32xf32>
    %167 = vector.extract_strided_slice %10 {offsets = [0, 2], sizes = [8, 1], strides = [1, 1]} : vector<8x16xf32> to vector<8x1xf32>
    %168 = vector.broadcast %167 : vector<8x1xf32> to vector<8x32xf32>
    %169 = arith.mulf %166, %168 : vector<8x32xf32>
    %170 = arith.addf %165, %169 : vector<8x32xf32>
    %171 = vector.extract_strided_slice %155 {offsets = [0, 96], sizes = [8, 32], strides = [1, 1]} : vector<8x512xf32> to vector<8x32xf32>
    %172 = vector.extract_strided_slice %10 {offsets = [0, 3], sizes = [8, 1], strides = [1, 1]} : vector<8x16xf32> to vector<8x1xf32>
    %173 = vector.broadcast %172 : vector<8x1xf32> to vector<8x32xf32>
    %174 = arith.mulf %171, %173 : vector<8x32xf32>
    %175 = arith.addf %170, %174 : vector<8x32xf32>
    %176 = vector.extract_strided_slice %155 {offsets = [0, 128], sizes = [8, 32], strides = [1, 1]} : vector<8x512xf32> to vector<8x32xf32>
    %177 = vector.extract_strided_slice %10 {offsets = [0, 4], sizes = [8, 1], strides = [1, 1]} : vector<8x16xf32> to vector<8x1xf32>
    %178 = vector.broadcast %177 : vector<8x1xf32> to vector<8x32xf32>
    %179 = arith.mulf %176, %178 : vector<8x32xf32>
    %180 = arith.addf %175, %179 : vector<8x32xf32>
    %181 = vector.extract_strided_slice %155 {offsets = [0, 160], sizes = [8, 32], strides = [1, 1]} : vector<8x512xf32> to vector<8x32xf32>
    %182 = vector.extract_strided_slice %10 {offsets = [0, 5], sizes = [8, 1], strides = [1, 1]} : vector<8x16xf32> to vector<8x1xf32>
    %183 = vector.broadcast %182 : vector<8x1xf32> to vector<8x32xf32>
    %184 = arith.mulf %181, %183 : vector<8x32xf32>
    %185 = arith.addf %180, %184 : vector<8x32xf32>
    %186 = vector.extract_strided_slice %155 {offsets = [0, 192], sizes = [8, 32], strides = [1, 1]} : vector<8x512xf32> to vector<8x32xf32>
    %187 = vector.extract_strided_slice %10 {offsets = [0, 6], sizes = [8, 1], strides = [1, 1]} : vector<8x16xf32> to vector<8x1xf32>
    %188 = vector.broadcast %187 : vector<8x1xf32> to vector<8x32xf32>
    %189 = arith.mulf %186, %188 : vector<8x32xf32>
    %190 = arith.addf %185, %189 : vector<8x32xf32>
    %191 = vector.extract_strided_slice %155 {offsets = [0, 224], sizes = [8, 32], strides = [1, 1]} : vector<8x512xf32> to vector<8x32xf32>
    %192 = vector.extract_strided_slice %10 {offsets = [0, 7], sizes = [8, 1], strides = [1, 1]} : vector<8x16xf32> to vector<8x1xf32>
    %193 = vector.broadcast %192 : vector<8x1xf32> to vector<8x32xf32>
    %194 = arith.mulf %191, %193 : vector<8x32xf32>
    %195 = arith.addf %190, %194 : vector<8x32xf32>
    %196 = vector.extract_strided_slice %155 {offsets = [0, 256], sizes = [8, 32], strides = [1, 1]} : vector<8x512xf32> to vector<8x32xf32>
    %197 = vector.extract_strided_slice %10 {offsets = [0, 8], sizes = [8, 1], strides = [1, 1]} : vector<8x16xf32> to vector<8x1xf32>
    %198 = vector.broadcast %197 : vector<8x1xf32> to vector<8x32xf32>
    %199 = arith.mulf %196, %198 : vector<8x32xf32>
    %200 = arith.addf %195, %199 : vector<8x32xf32>
    %201 = vector.extract_strided_slice %155 {offsets = [0, 288], sizes = [8, 32], strides = [1, 1]} : vector<8x512xf32> to vector<8x32xf32>
    %202 = vector.extract_strided_slice %10 {offsets = [0, 9], sizes = [8, 1], strides = [1, 1]} : vector<8x16xf32> to vector<8x1xf32>
    %203 = vector.broadcast %202 : vector<8x1xf32> to vector<8x32xf32>
    %204 = arith.mulf %201, %203 : vector<8x32xf32>
    %205 = arith.addf %200, %204 : vector<8x32xf32>
    %206 = vector.extract_strided_slice %155 {offsets = [0, 320], sizes = [8, 32], strides = [1, 1]} : vector<8x512xf32> to vector<8x32xf32>
    %207 = vector.extract_strided_slice %10 {offsets = [0, 10], sizes = [8, 1], strides = [1, 1]} : vector<8x16xf32> to vector<8x1xf32>
    %208 = vector.broadcast %207 : vector<8x1xf32> to vector<8x32xf32>
    %209 = arith.mulf %206, %208 : vector<8x32xf32>
    %210 = arith.addf %205, %209 : vector<8x32xf32>
    %211 = vector.extract_strided_slice %155 {offsets = [0, 352], sizes = [8, 32], strides = [1, 1]} : vector<8x512xf32> to vector<8x32xf32>
    %212 = vector.extract_strided_slice %10 {offsets = [0, 11], sizes = [8, 1], strides = [1, 1]} : vector<8x16xf32> to vector<8x1xf32>
    %213 = vector.broadcast %212 : vector<8x1xf32> to vector<8x32xf32>
    %214 = arith.mulf %211, %213 : vector<8x32xf32>
    %215 = arith.addf %210, %214 : vector<8x32xf32>
    %216 = vector.extract_strided_slice %155 {offsets = [0, 384], sizes = [8, 32], strides = [1, 1]} : vector<8x512xf32> to vector<8x32xf32>
    %217 = vector.extract_strided_slice %10 {offsets = [0, 12], sizes = [8, 1], strides = [1, 1]} : vector<8x16xf32> to vector<8x1xf32>
    %218 = vector.broadcast %217 : vector<8x1xf32> to vector<8x32xf32>
    %219 = arith.mulf %216, %218 : vector<8x32xf32>
    %220 = arith.addf %215, %219 : vector<8x32xf32>
    %221 = vector.extract_strided_slice %155 {offsets = [0, 416], sizes = [8, 32], strides = [1, 1]} : vector<8x512xf32> to vector<8x32xf32>
    %222 = vector.extract_strided_slice %10 {offsets = [0, 13], sizes = [8, 1], strides = [1, 1]} : vector<8x16xf32> to vector<8x1xf32>
    %223 = vector.broadcast %222 : vector<8x1xf32> to vector<8x32xf32>
    %224 = arith.mulf %221, %223 : vector<8x32xf32>
    %225 = arith.addf %220, %224 : vector<8x32xf32>
    %226 = vector.extract_strided_slice %155 {offsets = [0, 448], sizes = [8, 32], strides = [1, 1]} : vector<8x512xf32> to vector<8x32xf32>
    %227 = vector.extract_strided_slice %10 {offsets = [0, 14], sizes = [8, 1], strides = [1, 1]} : vector<8x16xf32> to vector<8x1xf32>
    %228 = vector.broadcast %227 : vector<8x1xf32> to vector<8x32xf32>
    %229 = arith.mulf %226, %228 : vector<8x32xf32>
    %230 = arith.addf %225, %229 : vector<8x32xf32>
    %231 = vector.extract_strided_slice %155 {offsets = [0, 480], sizes = [8, 32], strides = [1, 1]} : vector<8x512xf32> to vector<8x32xf32>
    %232 = vector.extract_strided_slice %10 {offsets = [0, 15], sizes = [8, 1], strides = [1, 1]} : vector<8x16xf32> to vector<8x1xf32>
    %233 = vector.broadcast %232 : vector<8x1xf32> to vector<8x32xf32>
    %234 = arith.mulf %231, %233 : vector<8x32xf32>
    %235 = arith.addf %230, %234 : vector<8x32xf32>
    %236 = vector.extract_strided_slice %94 {offsets = [7, 0], sizes = [1, 512], strides = [1, 1]} : vector<8x512xf32> to vector<1x512xf32>
    %c0_44 = arith.constant 0 : index
    %c0_45 = arith.constant 0 : index
    %237 = vector.load %arg11[%c0_44, %c0_45] : memref<1x512xf32, #tpu.memory_space<vmem>>, vector<1x512xf32>
    tpu.vector_store %arg11[%c0_44, %c0_45], %236 {strides = array<i32>} : memref<1x512xf32, #tpu.memory_space<vmem>>, vector<1x512xf32>,
    %238 = vector.extract_strided_slice %154 {offsets = [7, 0], sizes = [1, 512], strides = [1, 1]} : vector<8x512xf32> to vector<1x512xf32>
    %c0_46 = arith.constant 0 : index
    %c0_47 = arith.constant 0 : index
    %239 = vector.load %arg12[%c0_46, %c0_47] : memref<1x512xf32, #tpu.memory_space<vmem>>, vector<1x512xf32>
    tpu.vector_store %arg12[%c0_46, %c0_47], %238 {strides = array<i32>} : memref<1x512xf32, #tpu.memory_space<vmem>>, vector<1x512xf32>,
    %240 = vector.broadcast %11 : vector<1x32xf32> to vector<8x32xf32>
    %241 = arith.mulf %4, %240 : vector<8x32xf32>
    %242 = arith.addf %235, %241 : vector<8x32xf32>
    %c0_48 = arith.constant 0 : index
    %c0_49 = arith.constant 0 : index
    %c0_50 = arith.constant 0 : index
    %243 = vector.load %arg10[%c0_48, %c0_49, %c0_50] : memref<1x8x32xf32, #tpu.memory_space<vmem>>, vector<1x8x32xf32>
    %244 = vector.shape_cast %243 : vector<1x8x32xf32> to vector<8x32xf32>
    %245 = vector.shape_cast %242 : vector<8x32xf32> to vector<1x8x32xf32>
    tpu.vector_store %arg10[%c0_48, %c0_49, %c0_50], %245 {strides = array<i32>} : memref<1x8x32xf32, #tpu.memory_space<vmem>>, vector<1x8x32xf32>,
    return
  }
  func.func @transform_0(%arg0: i32, %arg1: i32, %arg2: i32) -> (i32, i32, i32) {
    %c0_i32 = arith.constant 0 : i32
    return %arg0, %arg2, %arg1 : i32, i32, i32
  }
  func.func @transform_1(%arg0: i32, %arg1: i32, %arg2: i32) -> (i32, i32, i32) {
    %c0_i32 = arith.constant 0 : i32
    return %arg0, %arg2, %arg1 : i32, i32, i32
  }
  func.func @transform_2(%arg0: i32, %arg1: i32, %arg2: i32) -> (i32, i32) {
    %c0_i32 = arith.constant 0 : i32
    %c0_i32_0 = arith.constant 0 : i32
    return %c0_i32, %arg1 : i32, i32
  }
  func.func @transform_3(%arg0: i32, %arg1: i32, %arg2: i32) -> (i32, i32, i32) {
    %c0_i32 = arith.constant 0 : i32
    %c0_i32_0 = arith.constant 0 : i32
    return %arg0, %arg2, %c0_i32 : i32, i32, i32
  }
  func.func @transform_4(%arg0: i32, %arg1: i32, %arg2: i32) -> (i32, i32, i32) {
    %c0_i32 = arith.constant 0 : i32
    %c0_i32_0 = arith.constant 0 : i32
    return %arg0, %arg2, %c0_i32 : i32, i32, i32
  }
  func.func @transform_5(%arg0: i32, %arg1: i32, %arg2: i32) -> (i32, i32) {
    %c0_i32 = arith.constant 0 : i32
    %c0_i32_0 = arith.constant 0 : i32
    return %c0_i32, %arg1 : i32, i32
  }
  func.func @transform_6(%arg0: i32, %arg1: i32, %arg2: i32) -> (i32, i32) {
    %c0_i32 = arith.constant 0 : i32
    %c0_i32_0 = arith.constant 0 : i32
    %c0_i32_1 = arith.constant 0 : i32
    return %c0_i32, %c0_i32_0 : i32, i32
  }
  func.func @transform_7(%arg0: i32, %arg1: i32, %arg2: i32) -> (i32, i32, i32) {
    %c0_i32 = arith.constant 0 : i32
    return %arg0, %arg2, %arg1 : i32, i32, i32
  }
}

</mosaic_0001>

<bundles_post_ra>
// kernel: tpu_custom_call.1
= control target key start
LH: loop header
LB: loop body
LE: loop exit
PB: predicated region body
PF: predicated region fallthrough
CT: control target
= control target key end

     0   :  { %s2732_s0 = inlined_call_operand.hbm [shape: f32[2,16,32], index: 0, kind: input, shape index: {}]   ;;  %s2733_s1 = inlined_call_operand.hbm [shape: f32[2,16,32], index: 1, kind: input, shape index: {}]   ;;  %s2734_s2 = inlined_call_operand.hbm [shape: f32[16,32], index: 2, kind: input, shape index: {}]   ;;  %s2735_s3 = inlined_call_operand.hbm [shape: f32[2,16,16], index: 3, kind: input, shape index: {}]   ;;  %s2736_s4 = inlined_call_operand.hbm [shape: f32[2,16,16], index: 4, kind: input, shape index: {}]   ;;  %s2737_s5 = inlined_call_operand.vmem [shape: f32[1,32], index: 5, kind: input, shape index: {}]   ;;  %s2738_s6 = inlined_call_operand.vmem [shape: f32[8,8], index: 6, kind: input, shape index: {}]   ;;  %s2739_s7 = inlined_call_operand.hbm [shape: f32[2,16,32], index: 7, kind: output, shape index: {}]  }
   0x1   :  { %2749 = sst [smem:[#allocation26_spill]] %s2732_s0 }
   0x2   :  { %2750 = sst [smem:[#allocation27_spill]] %s2734_s2 }
   0x3   :  { %2751 = sst [smem:[#allocation28_spill]] %s2735_s3 }
   0x4   :  { %2752 = sst [smem:[#allocation29_spill]] %s2739_s7 }
   0x5   :  { %12 = vsyncpa [#allocation5], 0 }
   0x6   :  { %14 = vsyncpa [#allocation5 + $0x1], 0 }
   0x7   :  { %15 = vsyncpa [#allocation8], 0 }
   0x8   :  { %17 = vsyncpa [#allocation8 + $0x1], 0 }
   0x9   :  { %18 = vsyncpa [#allocation11], 0 }
   0xa   :  { %20 = vsyncpa [#allocation11 + $0x1], 0 }
   0xb   :  { %21 = vsyncpa [#allocation6], 0 }
   0xc   :  { %23 = vsyncpa [#allocation6 + $0x1], 0  ;;  %s2218_s24 = smov 0   ;;  %s2220_s25 = smov 0  }
   0xd   :  { %s2222_s26 = smov 0   ;;  %s2224_s27 = smov 0  }
   0xe   :  { %s2226_s28 = smov 0   ;;  %s2228_s29 = smov 0  }
   0xf   :  { %s2230_s30 = smov 0   ;;  %s2232_s8 = smov 0  }
  0x10 LB: > { %2753 = sst [smem:[#allocation19_spill]] %s2118_s24  ;;  %s2259_s9 = sadd.s32 4294967295, %s2146_s8   ;;  %s2146_s8 = sphi %s2232_s8, %s29_s8   ;;  %s2142_s30 = sphi %s2230_s30, %s2782_s30   ;;  %s2138_s29 = sphi %s2228_s29, %s2781_s29   ;;  %s2134_s28 = sphi %s2226_s28, %s2780_s28   ;;  %s2130_s27 = sphi %s2224_s27, %s2779_s27   ;;  %s2126_s26 = sphi %s2222_s26, %s2785_s26   ;;  %s2122_s25 = sphi %s2220_s25, %s2784_s25   ;;  %s2118_s24 = sphi %s2218_s24, %s2783_s24  }
  0x11   : > { %2754 = sst [smem:[#allocation20_spill]] %s2138_s29  ;;  %s1640_s10 = sadd.s32 4294967294, %s2146_s8  }
  0x12   : > { %2755 = sst [smem:[#allocation21_spill]] %s2142_s30  ;;  %p72_p0 = scmp.ne.s32.totalorder %s2122_s25, %s2118_s24 }
  0x13   : > { %p73_p1 = scmp.eq.s32.totalorder %s2259_s9, 0  ;;  %p265_p3 = scmp.eq.s32.totalorder %s1640_s10, 3 }
  0x14   : > { %p1641_p5 = scmp.ge.s32.totalorder %s2146_s8, 1  ;;  %p272_p7 = scmp.lt.s32.totalorder %s2146_s8, 5 }
  0x15   : > { %p2268_p4 = por %p73_p1, %p72_p0  ;;  %p2273_p6 = por %p265_p3, %p72_p0 }
  0x16   : > { %p2278_p8 = pnand %p1641_p5, %p272_p7  ;;  %s2148_s14 = smov [#allocation9]  }
  0x17   : > { %s2757_s12 = scalar_select %p2273_p6, 1, 0 }
  0x18   : > { %s286_s15 = sshll.u32 %s2148_s14, 4  ;;  %p1705_p9 = pneg %p2278_p8  ;;  %s287_s15 = int_to_ptr.vmem [resolvable:$true] %s286_s15 }
  0x19   : > { %2758 = sst [smem:[#allocation22_spill]] %s2757_s12  ;;  %s1911_s16 = scalar_lea.vmem %s287_s15, 256 }
  0x1a   : > { %p1706_p10 = pnand %p1705_p9, %p73_p1  ;;  %p1912_p12 = scmp.ne.s32.totalorder %s287_s15, %s1911_s16 }
  0x1b   : > { %p1919_p3 = scmp.lt.s32.totalorder %s287_s15, %s287_s15  ;;  %p1920_p2 = scmp.lt.s32.totalorder %s1911_s16, %s1911_s16 }
  0x1c   : > { %p1902_p11 = pneg %p1706_p10 }
  0x1d   : > { %p1921_p6 = por %p1920_p2, %p1919_p3 }
  0x1e   : > { %p1914_p13 = pnand %p1912_p12, %p1902_p11 }
  0x20   : > { %p1915_p0 = pneg %p1914_p13 }
  0x22   : > { %p1922_p5 = pnand %p1921_p6, %p1915_p0 }
  0x24   : > { %1925 = shalt.err (!%p1922_p5)
}
  0x25   : > { %s2149_s17 = smov 128   ;;  %s2150_s18 = smov 8  }
  0x26   : > { %s2760_s2 = sld [smem:[#allocation27_spill]]  ;;  %s41_s21 = sadd.s32 1, %s2138_s29 }
  0x27   : > { %p42_p2 = scmp.ge.s32.totalorder %s41_s21, 2  ;;  %s48_s22 = sadd.s32 1, %s2142_s30 }
  0x28   : > { %s59_s23 = sadd.s32 1, %s2126_s26  ;;  %p66_p6 = scmp.ne.s32.totalorder %s2126_s26, %s2122_s25 }
  0x29   : > { %s2787_s21 = smov (%p42_p2, %s41_s21), 0  ;;  %s2789_s22 = smov (!%p42_p2, %s48_s22), %s2142_s30 }
  0x2a   : > { %2761 = sst [smem:[#allocation23_spill]] %s2787_s21  ;;  %s53_s10 = ssub.s32 %s2138_s29, %s2787_s21 }
  0x2b   : > { %p67_p7 = scmp.eq.s32.totalorder %s2146_s8, 0  ;;  %p50_p9 = scmp.ge.s32.totalorder %s2789_s22, 2 }
  0x2c   : > { %1708 = dma.hbm_to_vmem [thread:$0]  (!%p1706_p10), %s2760_s2, 256, %s287_s15, [#allocation8], %s2149_s17, %s2149_s17, %s2150_s18  }
  0x2d   : > { %p2762_p11 = scmp.eq.s32.totalorder %s2259_s9, 3  ;;  %p68_p12 = por %p67_p7, %p66_p6 }
  0x2e   : > { %p1727_p13 = scmp.lt.s32.totalorder %s2146_s8, 4  ;;  %s2791_s22 = smov (%p50_p9, %s2789_s22), 0 }
  0x2f   : > { %p2302_p10 = por %p2762_p11, %p66_p6  ;;  %2764 = sst [smem:[#allocation24_spill]] %s2791_s22 }
  0x30   : > { %s2745_s15 = sand.u32 1, %s2126_s26   ;;  %s1646_s16 = sshll.u32 %s2142_s30, 1 }
  0x31   : > { %s52_s17 = ssub.s32 %s2142_s30, %s2791_s22  ;;  %s2315_s18 = sshll.u32 %s2745_s15, 3 }
  0x32   : > { %s54_s19 = sor.u32 %s53_s10, %s52_s17  ;;  %s319_s20 = sadd.s32 %s2138_s29, %s1646_s16 }
  0x33   : > { %p57_p0 = scmp.eq.s32.totalorder %s54_s19, 0  ;;  %s2318_s2 = sshll.u32 %s319_s20, 7 }
  0x34   : > { %p2320_p3 = pnand %p1727_p13, %p68_p12  ;;  %s2747_s12 = sand.u32 1, %s2146_s8  }
  0x35   : > { %s2326_s24 = scalar_select %p57_p0, %s2126_s26, %s59_s23  }
  0x36   : > { %s2767_s3 = sld [smem:[#allocation28_spill]]  ;;  %s355_s7 = scalar_lea.vmem [#allocation10], %s2315_s18 }
  0x37   : > { %2766 = sst [smem:[#allocation25_spill]] %s2326_s24  ;;  %s364_s10 = sshll.u32 %s355_s7, 4  ;;  %s365_s10 = int_to_ptr.vmem [resolvable:$true] %s364_s10 }
  0x38   : > { %s2335_s16 = scalar_lea.sflag [#allocation11], %s2747_s12  ;;  %p1928_p5 = pneg %p2320_p3 }
  0x39   : > { %s1939_s17 = scalar_lea.vmem %s365_s10, 128  ;;  %s2151_s23 = smov [#allocation10]  }
  0x3a   : > { %p1940_p2 = scmp.ne.s32.totalorder %s365_s10, %s1939_s17  ;;  %s1944_s19 = sshll.u32 %s2151_s23, 4  ;;  %s1945_s19 = int_to_ptr.vmem [resolvable:$false] %s1944_s19 }
  0x3b   : > { %s1946_s20 = scalar_lea.vmem %s1945_s19, 256  ;;  %p1947_p9 = scmp.lt.s32.totalorder %s365_s10, %s1945_s19 }
  0x3c   : > { %s362_s15 = scalar_lea.hbm %s2767_s3, %s2318_s2  ;;  %p1942_p6 = pnand %p1940_p2, %p1928_p5 }
  0x3d   : > { %p1948_p11 = scmp.lt.s32.totalorder %s1946_s20, %s1939_s17 }
  0x3e   : > { %p1943_p7 = pneg %p1942_p6 }
  0x3f   : > { %p1949_p12 = por %p1948_p11, %p1947_p9 }
  0x41   : > { %p1950_p13 = pnand %p1949_p12, %p1943_p7 }
  0x43   : > { %1953 = shalt.err (!%p1950_p13)
}
  0x44   : > { %1718 = dma.hbm_to_vmem [thread:$0]  (!%p2320_p3), %s362_s15, 128, %s365_s10, %s2335_s16  }
  0x45   : > { %s2768_s0 = sld [smem:[#allocation26_spill]]  ;;  %s313_s23 = scalar_lea.vmem [#allocation4], %s2315_s18 }
  0x46   : > { %s323_s12 = sshll.u32 %s313_s23, 4  ;;  %s2769_s3 = sand.u32 1, %s2126_s26   ;;  %s324_s12 = int_to_ptr.vmem [resolvable:$true] %s323_s12 }
  0x47   : > { %s310_s29 = scalar_lea.sflag [#allocation5], %s2769_s3  ;;  %s1967_s24 = scalar_lea.vmem %s324_s12, 128 }
  0x48   : > { %p1968_p0 = scmp.ne.s32.totalorder %s324_s12, %s1967_s24  ;;  %s2152_s15 = smov [#allocation4]  }
  0x49   : > { %s1972_s10 = sshll.u32 %s2152_s15, 4  ;;  %s1973_s10 = int_to_ptr.vmem [resolvable:$false] %s1972_s10 }
  0x4a   : > { %p1970_p2 = pnand %p1968_p0, %p1928_p5  ;;  %s1974_s7 = scalar_lea.vmem %s1973_s10, 256 }
  0x4b   : > { %s321_s22 = scalar_lea.hbm %s2768_s0, %s2318_s2  ;;  %p1975_p7 = scmp.lt.s32.totalorder %s324_s12, %s1973_s10 }
  0x4c   : > { %p1971_p6 = pneg %p1970_p2  ;;  %p1976_p9 = scmp.lt.s32.totalorder %s1974_s7, %s1967_s24 }
  0x4e   : > { %p1977_p11 = por %p1976_p9, %p1975_p7 }
  0x50   : > { %p1978_p12 = pnand %p1977_p11, %p1971_p6 }
  0x52   : > { %1981 = shalt.err (!%p1978_p12)
}
  0x53   : > { %1712 = dma.hbm_to_vmem [thread:$0]  (!%p2320_p3), %s321_s22, 128, %s324_s12, %s310_s29  }
  0x54   : > { %s334_s3 = scalar_lea.vmem [#allocation7], %s2315_s18  ;;  %s382_s19 = scalar_lea.hbm %s2736_s4, %s2318_s2 }
  0x55   : > { %s344_s30 = sshll.u32 %s334_s3, 4  ;;  %s2770_s15 = sand.u32 1, %s2146_s8   ;;  %s345_s30 = int_to_ptr.vmem [resolvable:$true] %s344_s30 }
  0x56   : > { %s331_s10 = scalar_lea.sflag [#allocation8], %s2770_s15  ;;  %s1995_s24 = scalar_lea.vmem %s345_s30, 128 }
  0x57   : > { %p1996_p13 = scmp.ne.s32.totalorder %s345_s30, %s1995_s24  ;;  %s2153_s7 = smov [#allocation7]  }
  0x58   : > { %s2000_s20 = sshll.u32 %s2153_s7, 4  ;;  %s2001_s20 = int_to_ptr.vmem [resolvable:$false] %s2000_s20 }
  0x59   : > { %p1998_p0 = pnand %p1996_p13, %p1928_p5  ;;  %s2002_s0 = scalar_lea.vmem %s2001_s20, 256 }
  0x5a   : > { %p2003_p6 = scmp.lt.s32.totalorder %s345_s30, %s2001_s20  ;;  %p2004_p7 = scmp.lt.s32.totalorder %s2002_s0, %s1995_s24 }
  0x5b   : > { %p1999_p2 = pneg %p1998_p0 }
  0x5c   : > { %p2005_p9 = por %p2004_p7, %p2003_p6 }
  0x5e   : > { %p2006_p11 = pnand %p2005_p9, %p1999_p2 }
  0x60   : > { %2009 = shalt.err (!%p2006_p11)
}
  0x61   : > { %s2771_s22 = scalar_lea.hbm %s2733_s1, %s2318_s2  ;;  %s375_s3 = scalar_lea.vmem [#allocation12], %s2315_s18 }
  0x62   : > { %1715 = dma.hbm_to_vmem [thread:$0]  (!%p2320_p3), %s2771_s22, 128, %s345_s30, %s331_s10  }
  0x63   : > { %s384_s23 = sshll.u32 %s375_s3, 4  ;;  %s2154_s0 = smov [#allocation12]   ;;  %s385_s23 = int_to_ptr.vmem [resolvable:$true] %s384_s23 }
  0x64   : > { %s2023_s17 = scalar_lea.vmem %s385_s23, 128  ;;  %s2028_s20 = sshll.u32 %s2154_s0, 4  ;;  %s2029_s20 = int_to_ptr.vmem [resolvable:$false] %s2028_s20 }
  0x65   : > { %p2024_p12 = scmp.ne.s32.totalorder %s385_s23, %s2023_s17  ;;  %s2030_s15 = scalar_lea.vmem %s2029_s20, 256 }
  0x66   : > { %p2031_p2 = scmp.lt.s32.totalorder %s385_s23, %s2029_s20  ;;  %p2032_p6 = scmp.lt.s32.totalorder %s2030_s15, %s2023_s17 }
  0x67   : > { %p2026_p13 = pnand %p2024_p12, %p1928_p5 }
  0x68   : > { %p2033_p7 = por %p2032_p6, %p2031_p2 }
  0x69   : > { %p2027_p0 = pneg %p2026_p13 }
  0x6b   : > { %p2034_p9 = pnand %p2033_p7, %p2027_p0 }
  0x6d   : > { %2037 = shalt.err (!%p2034_p9)
}
  0x6e   : > { %1721 = dma.hbm_to_vmem [thread:$0]  (!%p2320_p3), %s382_s19, 128, %s385_s23, %s2335_s16  }
  0x6f   : > { %393 = sbr.rel (%p2278_p8) target bundleno = 889 (0x379), region = 48  ;;  %s2393_s10 = sand.u32 (!%p2278_p8), 1, %s2122_s25  }
  0x70   : > { %s2396_s24 = sshll.u32 (!%p2278_p8), %s2393_s10, 3  ;;  %s396_s21 = scalar_lea.sflag (!%p2278_p8), [#allocation5], %s2393_s10 }
  0x71   : > { %s399_s7 = scalar_lea.vmem (!%p2278_p8), [#allocation4], %s2396_s24 }
  0x74   : > { %2097 = dma.done.wait (%p2268_p4), %s396_s21, 128  }
  0x75   : > { %2099 = vsyncadd (%p2268_p4), %s396_s21, 4294967168  ;;  %s404_s2 = sand.u32 1, %s2259_s9   ;;  %s408_s16 = scalar_lea.vmem [#allocation7], %s2396_s24 }
  0x76   : > { %s405_s13 = scalar_lea.sflag [#allocation8], %s404_s2 }
  0x77   : > { %2101 = dma.done.wait (%p2268_p4), %s405_s13, 128  }
  0x78   : > { %2103 = vsyncadd (%p2268_p4), %s405_s13, 4294967168 }
  0x79   : > { %2105 = dma.done.wait (%p73_p1), [#allocation8], 256  }
  0x7a   : > { %2107 = vsyncadd (%p73_p1), [#allocation8], 4294967040  ;;  %s418_s19 = scalar_lea.sflag [#allocation11], %s404_s2  ;;  %s421_s29 = scalar_lea.vmem [#allocation10], %s2396_s24 }
  0x7b   : > { %2109 = dma.done.wait (%p2268_p4), %s418_s19, 256  }
  0x7c   : > { %2111 = vsyncadd (%p2268_p4), %s418_s19, 4294967040  ;;  %s430_s12 = scalar_lea.vmem [#allocation12], %s2396_s24  ;;  %s478_s22 = scalar_lea.vmem [#allocation13], %s2396_s24 }
  0x7d   : > { %p1664_p8 = scmp.ne.s32.totalorder %s2130_s27, 0 }
  0x7f   : > { %485 = sbr.rel (%p1664_p8) target bundleno = 136 (0x88), region = 72 }
  0x84   : > { %v486_v0 = vlaneseq  ;;  %v2155_v1 = vmov 0.0  }
  0x86   : > { %vm488_vm0 = vcmp.lt.s32.totalorder %v486_v0, 512 }
  0x87   : > { %490 = vst.msk [vmem:[#allocation2] sm:$0xf] %vm488_vm0, %v2155_v1  ;;  %491 = vst.msk [vmem:[#allocation3] sm:$0xf] %vm488_vm0, %v2155_v1 }
  0x88 PF: > { %v2422_v2 = vld [vmem:[%s408_s16] sm:$0xff]  ;;  %v1671_v3 = vld [vmem:[#allocation9 + $0x6] ss:$0 sm:$0xff]  ;;  %v1670_v4 = vld [vmem:[#allocation9 + $0x5] ss:$0 sm:$0xff]  ;;  %v2156_v26 = vmov 1  }
  0x89   : > { %v562_v5 = vmul.f32 %v1671_v3, %v2422_v2  ;;  %v554_v6 = vmul.f32 %v1670_v4, %v2422_v2  ;;  %v1667_v7 = vld [vmem:[#allocation9 + $0x2] ss:$0 sm:$0xff]  ;;  %v1666_v8 = vld [vmem:[#allocation9 + $0x1] ss:$0 sm:$0xff]  ;;  %v1668_v11 = vld [vmem:[#allocation9 + $0x3] ss:$0 sm:$0xff]  ;;  %1820 = vset.pattern.permute.xlu1 %v2156_v26 }
  0x8a   : > { %v530_v9 = vmul.f32 %v1667_v7, %v2422_v2  ;;  %v522_v10 = vmul.f32 %v1666_v8, %v2422_v2  ;;  %v1672_v12 = vld [vmem:[#allocation9 + $0x7] ss:$0 sm:$0xff]  ;;  %v538_v15 = vmul.f32 %v1668_v11, %v2422_v2  ;;  %v1674_v19 = vld [vmem:[#allocation9 + $0x9] ss:$0 sm:$0xff]  ;;  %v1678_v20 = vld [vmem:[#allocation9 + $0xd] ss:$0 sm:$0xff] }
  0x8b   : > { %v563_v13 = vmul.f32 1.442695, %v562_v5  ;;  %v555_v14 = vmul.f32 1.442695, %v554_v6  ;;  %v570_v18 = vmul.f32 %v1672_v12, %v2422_v2  ;;  %v586_v22 = vmul.f32 %v1674_v19, %v2422_v2  ;;  %v1675_v25 = vld [vmem:[#allocation9 + $0xa] ss:$0 sm:$0xff] }
  0x8c   : > { %v531_v16 = vmul.f32 1.442695, %v530_v9  ;;  %v523_v17 = vmul.f32 1.442695, %v522_v10  ;;  %v539_v21 = vmul.f32 1.442695, %v538_v15  ;;  %v618_v24 = vmul.f32 %v1678_v20, %v2422_v2 }
  0x8d   : > { %1852 = vpow2.f32 %v563_v13  ;;  %v571_v23 = vmul.f32 1.442695, %v570_v18  ;;  %v1679_v27 = vld [vmem:[#allocation9 + $0xe] ss:$0 sm:$0xff]  ;;  %v2157_v28 = vmov 5   ;;  %v594_v30 = vmul.f32 %v1675_v25, %v2422_v2  ;;  %s2159_s9 = smov 64  }
  0x8e   : > { %1854 = vpow2.f32 %v555_v14  ;;  %1819 = vset.pattern.permute.xlu0 %v2157_v28  ;;  %v587_v29 = vmul.f32 1.442695, %v586_v22  ;;  %v619_v31 = vmul.f32 1.442695, %v618_v24  ;;  %v626_v32 = vmul.f32 %v1679_v27, %v2422_v2  ;;  %v1676_v33 = vld [vmem:[#allocation9 + $0xb] ss:$0 sm:$0xff] }
  0x8f   : > { %1856 = vpow2.f32 %v531_v16  ;;  %v1680_v34 = vld [vmem:[#allocation9 + $0xf] ss:$0 sm:$0xff]  ;;  %v595_v35 = vmul.f32 1.442695, %v594_v30  ;;  %v602_v36 = vmul.f32 %v1676_v33, %v2422_v2  ;;  %v2158_v39 = vmov 0.0   ;;  %s2160_s11 = smov 32  }
  0x90   : > { %1858 = vpow2.f32 %v523_v17  ;;  %v627_v37 = vmul.f32 1.442695, %v626_v32  ;;  %v634_v38 = vmul.f32 %v1680_v34, %v2422_v2  ;;  %769 = vmatprep.mubr.f32.mxu0 %v2158_v39  ;;  %840 = vmatprep.mubr.f32.mxu1 %v2158_v39  ;;  %s2161_s3 = smov 96   ;;  %v2454_v54 = vld [vmem:[%s421_s29] sm:$0xff]  ;;  %v2162_v55 = vmov 6   ;;  %p502_p1 = scmp.gt.s32.totalorder %s2130_s27, 0 }
  0x91   : > { %1860 = vpow2.f32 %v539_v21  ;;  %v603_v42 = vmul.f32 1.442695, %v602_v36  ;;  %v2163_v56 = vmov 2   ;;  %v2164_v57 = vmov 7   ;;  %v1669_v6 = vld [vmem:[#allocation9 + $0x4] ss:$0 sm:$0xff] }
  0x92   : > { %1862 = vpow2.f32 %v571_v23  ;;  %v635_v44 = vmul.f32 1.442695, %v634_v38  ;;  %v2165_v58 = vmov 13   ;;  %v2166_v59 = vmov 3   ;;  %v1665_v7 = vld [vmem:[#allocation9] ss:$0 sm:$0xff] }
  0x93   : > { %1864 = vpow2.f32 %v587_v29  ;;  %v2167_v60 = vmov 10   ;;  %v2168_v61 = vmov 9   ;;  %v2169_v62 = vmov 4   ;;  %v1673_v12 = vld [vmem:[#allocation9 + $0x8] ss:$0 sm:$0xff]  ;;  %s1687_s20 = sshll.u32 %s2134_s28, 1 }
  0x94   : > { %1866 = vpow2.f32 %v619_v31  ;;  %v2170_v63 = vmov 14   ;;  %v2171_v0 = vmov 8   ;;  %v2172_v1 = vmov 15   ;;  %v1677_v13 = vld [vmem:[#allocation9 + $0xc] ss:$0 sm:$0xff]  ;;  %v2495_v31 = vld [vmem:[%s2738_s6] sm:$0xff]  ;;  %s1449_s30 = sadd.s32 %s2130_s27, %s1687_s20 }
  0x95   : > { %1868 = vpow2.f32 %v595_v35  ;;  %v2173_v3 = vmov 11   ;;  %v2174_v4 = vmov 0   ;;  %v2175_v5 = vmov 12   ;;  %s503_s23 = scalar_select %p502_p1, 1, 0 }
  0x96   : > { %1870 = vpow2.f32 %v627_v37  ;;  %v546_v8 = vmul.f32 %v1669_v6, %v2422_v2  ;;  %v514_v9 = vmul.f32 %v1665_v7, %v2422_v2  ;;  %v578_v14 = vmul.f32 %v1673_v12, %v2422_v2  ;;  %v2515_v7 = vld [vmem:[%s399_s7] sm:$0xff]  ;;  %s1688_s21 = sshll.u32 %s1449_s30, 7  ;;  %s1453_s7 = sshll.u32 %s478_s22, 4  ;;  %s1454_s7 = int_to_ptr.vmem [resolvable:$true] %s1453_s7 }
  0x97   : > { %1872 = vpow2.f32 %v603_v42  ;;  %v610_v15 = vmul.f32 %v1677_v13, %v2422_v2  ;;  %v499_v16 = vlaneseq  ;;  %v504_v20 = vstv %s503_s23  ;;  %s2774_s13 = sld [smem:[#allocation29_spill]]  ;;  %s1437_s19 = scalar_lea.sflag [#allocation6], %s2393_s10 }
  0x98   : > { %1874 = vpow2.f32 %v635_v44  ;;  %v547_v10 = vmul.f32 1.442695, %v546_v8  ;;  %v515_v11 = vmul.f32 1.442695, %v514_v9  ;;  %v579_v17 = vmul.f32 1.442695, %v578_v14 }
  0x99   : > { %v611_v18 = vmul.f32 1.442695, %v610_v15  ;;  %v500_v19 = vand.u32 127, %v499_v16  ;;  %vm505_vm2 = vcmp.eq.s32.totalorder %v504_v20, 1  ;;  %vm685_vm3 = vcmask 261120   ;;  %s2038_s27 = scalar_lea.vmem %s1454_s7, 128 }
  0x9a   : > { %v1853_v40 = vpop.eup %1852  ;;  %1876 = vpow2.f32 %v547_v10  ;;  %vm687_vm5 = vcmask 523264   ;;  %vm689_vm6 = vcmask 785408   ;;  %vm701_vm7 = vcmask 64512   ;;  %p2039_p4 = scmp.ne.s32.totalorder %s1454_s7, %s2038_s27  ;;  %s2177_s29 = smov [#allocation13]  }
  0x9b   : > { %v1855_v41 = vpop.eup %1854  ;;  %654 = vrot.lane.b32.xlu1 %v1853_v40, %s2159_s9  ;;  %1878 = vpow2.f32 %v515_v11  ;;  %vm501_vm1 = vcmp.gt.s32.totalorder %v500_v19, 0  ;;  %v2519_v8 = vmul.f32 %v2422_v2, %v2515_v7  ;;  %vm2609_vm8 = vcmp.lt.s32.totalorder %v499_v16, 512 }
  0x9c   : > { %v1857_v43 = vpop.eup %1856  ;;  %650 = vrot.lane.b32.xlu0 %v1855_v41, %s2160_s11  ;;  %1880 = vpow2.f32 %v579_v17  ;;  %vm506_vm4 = vmor %vm501_vm1, %vm505_vm2  ;;  %p2040_p3 = pnand %p2039_p4, %p2302_p10 }
  0x9d   : > { %v1859_v45 = vpop.eup %1858  ;;  %1882 = vpow2.f32 %v611_v18  ;;  %v507_v32 = vsel %vm506_vm4, 1.0, %v2158_v39  ;;  %s1451_s16 = scalar_lea.hbm %s2774_s13, %s1688_s21 }
  0x9e   : > { %v1861_v46 = vpop.eup %1860  ;;  %v508_v38 = vmul.f32 %v507_v32, %v2495_v31  ;;  %p2041_p5 = pneg %p2040_p3 }
  0x9f   : > { %642 = vrot.lane.b32.xlu1 %v1857_v43, %s2159_s9  ;;  %v1863_v47 = vpop.eup %1862 }
  0xa0   : > { %638 = vrot.lane.b32.xlu0 %v1859_v45, %s2160_s11  ;;  %v1865_v48 = vpop.eup %1864 }
  0xa1   : > { %v1867_v49 = vpop.eup %1866 }
  0xa2   : > { %v1869_v50 = vpop.eup %1868 }
  0xa3   : > { %646 = vrot.lane.b32.xlu1 %v1861_v46, %s2161_s3  ;;  %v1871_v51 = vpop.eup %1870 }
  0xa4   : > { %658 = vrot.lane.b32.xlu0 %v1863_v47, %s2161_s3  ;;  %v1873_v52 = vpop.eup %1872 }
  0xa5   : > { %v1875_v53 = vpop.eup %1874 }
  0xa7   : > { %662 = vrot.lane.b32.xlu1 %v1865_v48, %s2160_s11  ;;  %v1877_v23 = vpop.eup %1876 }
  0xa8   : > { %674 = vrot.lane.b32.xlu0 %v1867_v49, %s2160_s11  ;;  %v1879_v24 = vpop.eup %1878 }
  0xa9   : > { %v1881_v41 = vpop.eup %1880 }
  0xaa   : > { %v1883_v43 = vpop.eup %1882 }
  0xab   : > { %666 = vrot.lane.b32.xlu1 %v1869_v50, %s2159_s9 }
  0xac   : > { %678 = vrot.lane.b32.xlu0 %v1871_v51, %s2159_s9 }
  0xaf   : > { %670 = vrot.lane.b32.xlu1 %v1873_v52, %s2161_s3 }
  0xb0   : > { %682 = vrot.lane.b32.xlu0 %v1875_v53, %s2161_s3 }
  0xb3   : > { %903 = vperm.xlu1 %1820, %v2454_v54  }
  0xb4   : > { %923 = vperm.xlu0 %1819, %v2454_v54  }
  0xb7   : > { %1821 = vset.pattern.permute.xlu1 %v2162_v55 }
  0xb8   : > { %928 = vperm.xlu1 %1821, %v2454_v54   ;;  %1822 = vset.pattern.permute.xlu0 %v2163_v56 }
  0xb9   : > { %908 = vperm.xlu0 %1822, %v2454_v54  }
  0xbc   : > { %1823 = vset.pattern.permute.xlu1 %v2164_v57 }
  0xbd   : > { %933 = vperm.xlu1 %1823, %v2454_v54   ;;  %1825 = vset.pattern.permute.xlu0 %v2165_v58 }
  0xbe   : > { %963 = vperm.xlu0 %1825, %v2454_v54  }
  0xc1   : > { %1824 = vset.pattern.permute.xlu1 %v2166_v59 }
  0xc2   : > { %913 = vperm.xlu1 %1824, %v2454_v54   ;;  %1828 = vset.pattern.permute.xlu0 %v2167_v60 }
  0xc3   : > { %948 = vperm.xlu0 %1828, %v2454_v54  }
  0xc6   : > { %1826 = vset.pattern.permute.xlu1 %v2168_v61 }
  0xc7   : > { %943 = vperm.xlu1 %1826, %v2454_v54   ;;  %1831 = vset.pattern.permute.xlu0 %v2169_v62 }
  0xc8   : > { %918 = vperm.xlu0 %1831, %v2454_v54  }
  0xcb   : > { %1827 = vset.pattern.permute.xlu1 %v2170_v63 }
  0xcc   : > { %968 = vperm.xlu1 %1827, %v2454_v54   ;;  %1834 = vset.pattern.permute.xlu0 %v2171_v0 }
  0xd0   : > { %1829 = vset.pattern.permute.xlu1 %v2172_v1 }
  0xd1   : > { %973 = vperm.xlu1 %1829, %v2454_v54  }
  0xd5   : > { %1830 = vset.pattern.permute.xlu1 %v2173_v3 }
  0xd6   : > { %953 = vperm.xlu1 %1830, %v2454_v54  }
  0xda   : > { %1832 = vset.pattern.permute.xlu1 %v2174_v4 }
  0xdb   : > { %898 = vperm.xlu1 %1832, %v2454_v54  }
  0xdf   : > { %1833 = vset.pattern.permute.xlu1 %v2175_v5 }
 0x10d   : > { %v655_v21 = vpop.permute.xlu1 %654 }
 0x10e   : > { %v651_v22 = vpop.permute.xlu0 %650 }
 0x10f   : > { %v691_v29 = vsel %vm685_vm3, %v1877_v23, %v651_v22 }
 0x110   : > { %v692_v36 = vsel %vm687_vm5, %v691_v29, %v655_v21 }
 0x111   : > { %v643_v25 = vpop.permute.xlu1 %642 }
 0x112   : > { %v639_v27 = vpop.permute.xlu0 %638 }
 0x113   : > { %v686_v30 = vsel %vm685_vm3, %v1879_v24, %v639_v27 }
 0x114   : > { %v688_v34 = vsel %vm687_vm5, %v686_v30, %v643_v25 }
 0x115   : > { %v647_v33 = vpop.permute.xlu1 %646 }
 0x116   : > { %v659_v35 = vpop.permute.xlu0 %658  ;;  %v690_v37 = vsel %vm689_vm6, %v688_v34, %v647_v33  ;;  %v2551_v33 = vld [vmem:[%s430_s12] sm:$0xff]  ;;  %s2042_s12 = sshll.u32 %s2177_s29, 4  ;;  %s2043_s12 = int_to_ptr.vmem [resolvable:$false] %s2042_s12 }
 0x117   : > { %v693_v40 = vsel %vm689_vm6, %v692_v36, %v659_v35  ;;  %v2176_v35 = vmov 1966171168   ;;  %p2045_p11 = scmp.lt.s32.totalorder %s1454_s7, %s2043_s12 }
 0x118   : > { %735 = vmatprep.subr.mxu0 %v693_v40  ;;  %v1368_v36 = vunpack.c.l.s4 %v2176_v35 }
 0x119   : > { %736 = vmatpush1.msra.mxu0 %v690_v37  ;;  %v663_v42 = vpop.permute.xlu1 %662 }
 0x11a   : > { %v675_v44 = vpop.permute.xlu0 %674  ;;  %1681 = vmatmul.mubr.msk.f32.vlgmr.msra.gmra.mxu0 %vm701_vm7, %v508_v38  ;;  %v694_v45 = vsel %vm685_vm3, %v1881_v41, %v663_v42  ;;  %v1369_v40 = vunpack.c.0.s8 %v1368_v36 }
 0x11b   : > { %1109 = vmatprep.mubr.f32.mxu0 %v2158_v39  ;;  %v697_v46 = vsel %vm685_vm3, %v1883_v43, %v675_v44 }
 0x11d   : > { %v667_v47 = vpop.permute.xlu1 %666 }
 0x11e   : > { %v679_v48 = vpop.permute.xlu0 %678  ;;  %v695_v49 = vsel %vm687_vm5, %v694_v45, %v667_v47 }
 0x11f   : > { %v698_v50 = vsel %vm687_vm5, %v697_v46, %v679_v48 }
 0x121   : > { %v671_v51 = vpop.permute.xlu1 %670 }
 0x122   : > { %v683_v52 = vpop.permute.xlu0 %682  ;;  %v696_v53 = vsel %vm689_vm6, %v695_v49, %v671_v51 }
 0x123   : > { %v699_v6 = vsel %vm689_vm6, %v698_v50, %v683_v52 }
 0x124   : > { %806 = vmatprep.subr.mxu1 %v699_v6 }
 0x125   : > { %807 = vmatpush1.msra.mxu1 %v696_v53 }
 0x126   : > { %1682 = vmatmul.mubr.msk.f32.vlgmr.msra.gmra.mxu1 %vm701_vm7, %v508_v38 }
 0x127   : > { %1180 = vmatprep.mubr.f32.mxu1 %v2158_v39 }
 0x12e   : > { %v904_v9 = vpop.permute.xlu1 %903 }
 0x12f   : > { %v906_v10 = vmul.f32 %v904_v9, %v2519_v8  ;;  %v924_v11 = vpop.permute.xlu0 %923 }
 0x130   : > { %v926_v12 = vmul.f32 %v924_v11, %v2519_v8 }
 0x131   : > { %978 = vrot.lane.b32.xlu0 %v906_v10, %s2160_s11 }
 0x132   : > { %990 = vrot.lane.b32.xlu1 %v926_v12, %s2160_s11 }
 0x133   : > { %v929_v13 = vpop.permute.xlu1 %928 }
 0x134   : > { %v931_v39 = vmul.f32 %v929_v13, %v2519_v8  ;;  %v909_v14 = vpop.permute.xlu0 %908 }
 0x135   : > { %v911_v15 = vmul.f32 %v909_v14, %v2519_v8 }
 0x136   : > { %994 = vrot.lane.b32.xlu1 %v931_v39, %s2159_s9 }
 0x137   : > { %982 = vrot.lane.b32.xlu0 %v911_v15, %s2159_s9 }
 0x138   : > { %v934_v2 = vpop.permute.xlu1 %933 }
 0x139   : > { %v936_v17 = vmul.f32 %v934_v2, %v2519_v8  ;;  %v964_v18 = vpop.permute.xlu0 %963 }
 0x13a   : > { %v966_v21 = vmul.f32 %v964_v18, %v2519_v8 }
 0x13b   : > { %998 = vrot.lane.b32.xlu1 %v936_v17, %s2161_s3 }
 0x13d   : > { %v914_v19 = vpop.permute.xlu1 %913 }
 0x13e   : > { %v916_v20 = vmul.f32 %v914_v19, %v2519_v8  ;;  %v949_v24 = vpop.permute.xlu0 %948 }
 0x13f   : > { %958 = vperm.xlu1 %1833, %v2454_v54   ;;  %v951_v27 = vmul.f32 %v949_v24, %v2519_v8 }
 0x140   : > { %986 = vrot.lane.b32.xlu0 %v916_v20, %s2161_s3 }
 0x142   : > { %v944_v22 = vpop.permute.xlu1 %943 }
 0x143   : > { %v946_v23 = vmul.f32 %v944_v22, %v2519_v8  ;;  %1014 = vrot.lane.b32.xlu1 %v966_v21, %s2160_s11  ;;  %v919_v45 = vpop.permute.xlu0 %918 }
 0x144   : > { %938 = vperm.xlu0 %1834, %v2454_v54   ;;  %1836 = vset.pattern.permute.xlu1 %v2163_v56  ;;  %v921_v19 = vmul.f32 %v919_v45, %v2519_v8 }
 0x147   : > { %v969_v25 = vpop.permute.xlu1 %968  ;;  %1002 = vrot.lane.b32.xlu1 %v946_v23, %s2160_s11 }
 0x148   : > { %v971_v29 = vmul.f32 %v969_v25, %v2519_v8  ;;  %1835 = vset.pattern.permute.xlu0 %v2156_v26  ;;  %v2582_v26 = vshrl.u32 %v499_v16, 7 }
 0x14a   : > { %1018 = vrot.lane.b32.xlu0 %v971_v29, %s2159_s9  ;;  %v862_v37 = vsub.s32 3, %v2582_v26  ;;  %v2597_v48 = vsub.s32 %v1369_v40, %v2582_v26 }
 0x14b   : > { %1006 = vrot.lane.b32.xlu1 %v951_v27, %s2159_s9 }
 0x14c   : > { %v974_v30 = vpop.permute.xlu1 %973 }
 0x14d   : > { %v976_v54 = vmul.f32 %v974_v30, %v2519_v8 }
 0x14f   : > { %1022 = vrot.lane.b32.xlu0 %v976_v54, %s2161_s3 }
 0x151   : > { %v954_v32 = vpop.permute.xlu1 %953 }
 0x152   : > { %v956_v56 = vmul.f32 %v954_v32, %v2519_v8 }
 0x153   : > { %1224 = vperm.xlu0 %1835, %v2551_v33  }
 0x154   : > { %1010 = vrot.lane.b32.xlu1 %v956_v56, %s2161_s3 }
 0x157   : > { %1838 = vset.pattern.permute.xlu0 %v2157_v28  ;;  %v850_v28 = vsub.s32 0, %v2582_v26 }
 0x158   : > { %1234 = vperm.xlu1 %1836, %v2551_v33   ;;  %1260 = vperm.xlu0 %1838, %v2551_v33  }
 0x15c   : > { %1837 = vset.pattern.permute.xlu1 %v2166_v59  ;;  %1841 = vset.pattern.permute.xlu0 %v2168_v61  ;;  %v899_v61 = vpop.permute.xlu1 %898 }
 0x15d   : > { %1244 = vperm.xlu1 %1837, %v2551_v33   ;;  %1296 = vperm.xlu0 %1841, %v2551_v33   ;;  %v901_v21 = vmul.f32 %v899_v61, %v2519_v8 }
 0x161   : > { %1839 = vset.pattern.permute.xlu1 %v2162_v55  ;;  %1844 = vset.pattern.permute.xlu0 %v2165_v58  ;;  %v700_v55 = vld [vmem:[#allocation2] sm:$0xf] }
 0x162   : > { %1270 = vperm.xlu1 %1839, %v2551_v33   ;;  %1332 = vperm.xlu0 %1844, %v2551_v33   ;;  %v851_v58 = vrot.slane %v700_v55, %v850_v28  ;;  %v863_v41 = vrot.slane %v700_v55, %v862_v37 }
 0x166   : > { %1840 = vset.pattern.permute.xlu1 %v2164_v57  ;;  %1847 = vset.pattern.permute.xlu0 %v2174_v4  ;;  %v854_v57 = vsub.s32 1, %v2582_v26 }
 0x167   : > { %1280 = vperm.xlu1 %1840, %v2551_v33   ;;  %1218 = vperm.xlu0 %1847, %v2551_v33  }
 0x168   : > { %v855_v59 = vrot.slane %v700_v55, %v854_v57 }
 0x16b   : > { %1842 = vset.pattern.permute.xlu1 %v2167_v60  ;;  %1849 = vset.pattern.permute.xlu0 %v2171_v0 }
 0x16c   : > { %1306 = vperm.xlu1 %1842, %v2551_v33  }
 0x170   : > { %1843 = vset.pattern.permute.xlu1 %v2173_v3 }
 0x171   : > { %1316 = vperm.xlu1 %1843, %v2551_v33  }
 0x175   : > { %1845 = vset.pattern.permute.xlu1 %v2170_v63 }
 0x176   : > { %1342 = vperm.xlu1 %1845, %v2551_v33  }
 0x17a   : > { %1846 = vset.pattern.permute.xlu1 %v2172_v1 }
 0x17b   : > { %1352 = vperm.xlu1 %1846, %v2551_v33  }
 0x17f   : > { %1848 = vset.pattern.permute.xlu1 %v2169_v62 }
 0x180   : > { %1254 = vperm.xlu1 %1848, %v2551_v33  }
 0x184   : > { %1850 = vset.pattern.permute.xlu1 %v2175_v5  ;;  %v858_v5 = vsub.s32 2, %v2582_v26 }
 0x186   : > { %v859_v38 = vrot.slane %v700_v55, %v858_v5 }
 0x1a3   : > { %v979_v11 = vpop.permute.xlu0 %978 }
 0x1a4   : > { %v991_v34 = vpop.permute.xlu1 %990  ;;  %v1025_v29 = vsel %vm685_vm3, %v901_v21, %v979_v11 }
 0x1a5   : > { %v1028_v25 = vsel %vm685_vm3, %v921_v19, %v991_v34 }
 0x1a8   : > { %v995_v43 = vpop.permute.xlu1 %994 }
 0x1a9   : > { %v983_v17 = vpop.permute.xlu0 %982  ;;  %v1029_v55 = vsel %vm687_vm5, %v1028_v25, %v995_v43 }
 0x1ad   : > { %v999_v6 = vpop.permute.xlu1 %998 }
 0x1b2   : > { %v987_v22 = vpop.permute.xlu0 %986 }
 0x1ba   : > { %v959_v15 = vpop.permute.xlu1 %958 }
 0x1be   : > { %v1015_v20 = vpop.permute.xlu1 %1014 }
 0x1bf   : > { %v939_v54 = vpop.permute.xlu0 %938 }
 0x1c2   : > { %v1003_v56 = vpop.permute.xlu1 %1002 }
 0x1c3   : > { %v1019_v34 = vpop.permute.xlu0 %1018 }
 0x1c6   : > { %v1007_v36 = vpop.permute.xlu1 %1006 }
 0x1da   : > { %v771_v60 = vpop.f32.mrf.mxu0 }
 0x1db   : > { %v868_v62 = vadd.f32 %v851_v58, %v771_v60 }
 0x1dc   : > { %v773_v63 = vpop.f32.mrf.mxu0 }
 0x1dd   : > { %v872_v0 = vmul.f32 1.442695, %v868_v62  ;;  %v869_v3 = vadd.f32 %v855_v59, %v773_v63  ;;  %v1026_v59 = vsel %vm687_vm5, %v1025_v29, %v983_v17  ;;  %v961_v63 = vmul.f32 %v959_v15, %v2519_v8  ;;  %v1041_v15 = vld [vmem:[#allocation3] sm:$0xf] }
 0x1de   : > { %v1195_v21 = vrot.slane %v1041_v15, %v854_v57  ;;  %v1203_v57 = vrot.slane %v1041_v15, %v862_v37 }
 0x1df   : > { %1884 = vpow2.f32 %v872_v0  ;;  %v874_v4 = vmul.f32 1.442695, %v869_v3  ;;  %v1365_v47 = vcombine.high %v868_v62, %v869_v3  ;;  %v1030_v62 = vsel %vm689_vm6, %v1029_v55, %v999_v6 }
 0x1e0   : > { %v1027_v0 = vsel %vm689_vm6, %v1026_v59, %v987_v22  ;;  %v1034_v40 = vsel %vm685_vm3, %v961_v63, %v1015_v20 }
 0x1e1   : > { %1886 = vpow2.f32 %v874_v4  ;;  %v1373_v9 = vrot.slane %v1365_v47, %v2597_v48  ;;  %v941_v4 = vmul.f32 %v939_v54, %v2519_v8 }
 0x1e6   : > { %v842_v42 = vpop.f32.mrf.mxu1 }
 0x1e7   : > { %v870_v44 = vadd.f32 %v859_v38, %v842_v42 }
 0x1e8   : > { %v844_v46 = vpop.f32.mrf.mxu1 }
 0x1e9   : > { %v876_v49 = vmul.f32 1.442695, %v870_v44  ;;  %v871_v50 = vadd.f32 %v863_v41, %v844_v46  ;;  %v1031_v41 = vsel %vm685_vm3, %v941_v4, %v1003_v56  ;;  %v1023_v46 = vpop.permute.xlu0 %1022 }
 0x1ea   : > { %v1032_v47 = vsel %vm687_vm5, %v1031_v41, %v1007_v36 }
 0x1eb   : > { %1888 = vpow2.f32 %v876_v49  ;;  %v878_v51 = vmul.f32 1.442695, %v871_v50  ;;  %v1366_v52 = vcombine.high %v870_v44, %v871_v50  ;;  %v1035_v44 = vsel %vm687_vm5, %v1034_v40, %v1019_v34  ;;  %v1011_v49 = vpop.permute.xlu1 %1010 }
 0x1ec   : > { %v2599_v53 = vpop.eup %1884  ;;  %v1033_v6 = vsel %vm689_vm6, %v1032_v47, %v1011_v49 }
 0x1ed   : > { %1890 = vpow2.f32 %v878_v51  ;;  %v1380_v10 = vrot.slane %v1366_v52, %v2597_v48  ;;  %v1036_v52 = vsel %vm689_vm6, %v1035_v44, %v1023_v46 }
 0x1ee   : > { %v2603_v12 = vpop.eup %1886  ;;  %1892 = vrcp.f32 %v2599_v53 }
 0x1ef   : > { %v1381_v13 = vcombine.high %v1373_v9, %v1380_v10  ;;  %1894 = vrcp.f32 %v2603_v12 }
 0x1f1   : > { %v1388_v39 = vrot.slane %v1381_v13, %v2597_v48  ;;  %v1235_v13 = vpop.permute.xlu1 %1234 }
 0x1f3   : > { %v1389_v2 = vcombine.high %v1388_v39, %v1388_v39 }
 0x1f5   : > { %1395 = vst.msk [vmem:[#allocation2] sm:$0xf] %vm2609_vm8, %v1389_v2  ;;  %v1245_v39 = vpop.permute.xlu1 %1244  ;;  %v1191_v2 = vrot.slane %v1041_v15, %v850_v28 }
 0x1f8   : > { %v2615_v18 = vpop.eup %1888 }
 0x1f9   : > { %1896 = vrcp.f32 %v2615_v18  ;;  %v1271_v17 = vpop.permute.xlu1 %1270 }
 0x1fa   : > { %v2620_v16 = vpop.eup %1890 }
 0x1fb   : > { %v1893_v23 = vpop.eup %1892  ;;  %1898 = vrcp.f32 %v2620_v16 }
 0x1fc   : > { %v1895_v24 = vpop.eup %1894  ;;  %v884_v27 = vmul.f32 %v1893_v23, %v2599_v53 }
 0x1fd   : > { %v885_v30 = vmul.f32 %v1895_v24, %v2603_v12  ;;  %v1281_v29 = vpop.permute.xlu1 %1280 }
 0x1fe   : > { %v888_v32 = vsub.f32 2.0, %v884_v27 }
 0x1ff   : > { %v889_v58 = vsub.f32 2.0, %v885_v30  ;;  %v1199_v30 = vrot.slane %v1041_v15, %v858_v5 }
 0x200   : > { %v892_v60 = vmul.f32 %v1893_v23, %v888_v32 }
 0x201   : > { %v893_v61 = vmul.f32 %v1895_v24, %v889_v58  ;;  %v1225_v24 = vpop.permute.xlu0 %1224 }
 0x202   : > { %v1037_v35 = vmul.f32 %v1027_v0, %v892_v60 }
 0x203   : > { %v1038_v3 = vmul.f32 %v1030_v62, %v893_v61 }
 0x205   : > { %1075 = vmatprep.subr.mxu0 %v1038_v3  ;;  %v1261_v54 = vpop.permute.xlu0 %1260 }
 0x206   : > { %v1897_v38 = vpop.eup %1896  ;;  %1076 = vmatpush1.msra.mxu0 %v1037_v35 }
 0x207   : > { %1683 = vmatmul.mubr.msk.f32.vlgmr.msra.gmra.mxu0 %vm701_vm7, %v2495_v31  ;;  %v886_v42 = vmul.f32 %v1897_v38, %v2615_v18 }
 0x208   : > { %v1899_v43 = vpop.eup %1898 }
 0x209   : > { %v890_v45 = vsub.f32 2.0, %v886_v42  ;;  %v887_v8 = vmul.f32 %v1899_v43, %v2620_v16  ;;  %v1297_v5 = vpop.permute.xlu0 %1296 }
 0x20b   : > { %v891_v50 = vsub.f32 2.0, %v887_v8  ;;  %v894_v51 = vmul.f32 %v1897_v38, %v890_v45 }
 0x20d   : > { %v895_v9 = vmul.f32 %v1899_v43, %v891_v50  ;;  %v1039_v11 = vmul.f32 %v1033_v6, %v894_v51 }
 0x20f   : > { %v1040_v10 = vmul.f32 %v1036_v52, %v895_v9 }
 0x211   : > { %1146 = vmatprep.subr.mxu1 %v1040_v10 }
 0x212   : > { %1147 = vmatpush1.msra.mxu1 %v1039_v11 }
 0x213   : > { %1684 = vmatmul.mubr.msk.f32.vlgmr.msra.gmra.mxu1 %vm701_vm7, %v2495_v31 }
 0x2c7   : > { %v1111_v19 = vpop.f32.mrf.mxu0 }
 0x2c8   : > { %v1208_v20 = vadd.f32 %v1191_v2, %v1111_v19 }
 0x2c9   : > { %v1113_v22 = vpop.f32.mrf.mxu0 }
 0x2ca   : > { %v1212_v23 = vmul.f32 %v2599_v53, %v1208_v20  ;;  %v1209_v25 = vadd.f32 %v1195_v21, %v1113_v22  ;;  %v1307_v53 = vpop.permute.xlu1 %1306 }
 0x2cc   : > { %v1237_v27 = vmul.f32 %v1235_v13, %v1212_v23  ;;  %v1227_v31 = vmul.f32 %v1225_v24, %v1212_v23  ;;  %v1213_v28 = vmul.f32 %v2603_v12, %v1209_v25  ;;  %v1247_v32 = vmul.f32 %v1245_v39, %v1212_v23 }
 0x2cd   : > { %v1400_v61 = vcombine.high %v1208_v20, %v1209_v25 }
 0x2ce   : > { %1239 = vrot.lane.b32.xlu0 %v1237_v27, %s2159_s9  ;;  %1229 = vrot.lane.b32.xlu1 %v1227_v31, %s2161_s3  ;;  %v1283_v58 = vmul.f32 %v1281_v29, %v1213_v28  ;;  %v1263_v60 = vmul.f32 %v1261_v54, %v1213_v28  ;;  %v1317_v63 = vpop.permute.xlu1 %1316  ;;  %v1273_v0 = vmul.f32 %v1271_v17, %v1213_v28 }
 0x2cf   : > { %v1408_v3 = vrot.slane %v1400_v61, %v2597_v48 }
 0x2d2   : > { %1290 = vperm.xlu0 %1849, %v2551_v33   ;;  %1249 = vrot.lane.b32.xlu1 %v1247_v32, %s2160_s11 }
 0x2d3   : > { %v1182_v56 = vpop.f32.mrf.mxu1 }
 0x2d4   : > { %v1210_v55 = vadd.f32 %v1199_v30, %v1182_v56 }
 0x2d5   : > { %v1184_v59 = vpop.f32.mrf.mxu1 }
 0x2d6   : > { %v1214_v12 = vmul.f32 %v2615_v18, %v1210_v55  ;;  %v1211_v62 = vadd.f32 %v1203_v57, %v1184_v59  ;;  %1285 = vrot.lane.b32.xlu0 %v1283_v58, %s2160_s11  ;;  %1265 = vrot.lane.b32.xlu1 %v1263_v60, %s2161_s3 }
 0x2d7   : > { %1851 = vset.pattern.permute.xlu0 %v2172_v1  ;;  %v1343_v1 = vpop.permute.xlu1 %1342 }
 0x2d8   : > { %v1401_v26 = vcombine.high %v1210_v55, %v1211_v62  ;;  %v1299_v37 = vmul.f32 %v1297_v5, %v1214_v12  ;;  %v1215_v18 = vmul.f32 %v2620_v16, %v1211_v62  ;;  %v1319_v35 = vmul.f32 %v1317_v63, %v1214_v12  ;;  %v1333_v16 = vpop.permute.xlu0 %1332 }
 0x2d9   : > { %v1309_v41 = vmul.f32 %v1307_v53, %v1214_v12 }
 0x2da   : > { %v1415_v4 = vrot.slane %v1401_v26, %v2597_v48  ;;  %1301 = vrot.lane.b32.xlu0 %v1299_v37, %s2161_s3  ;;  %1275 = vrot.lane.b32.xlu1 %v1273_v0, %s2159_s9  ;;  %v1345_v40 = vmul.f32 %v1343_v1, %v1215_v18  ;;  %v1335_v42 = vmul.f32 %v1333_v16, %v1215_v18 }
 0x2dc   : > { %v1416_v34 = vcombine.high %v1408_v3, %v1415_v4  ;;  %v1219_v44 = vpop.permute.xlu0 %1218 }
 0x2dd   : > { %v1221_v45 = vmul.f32 %v1219_v44, %v1212_v23 }
 0x2de   : > { %v1423_v36 = vrot.slane %v1416_v34, %v2597_v48  ;;  %1321 = vrot.lane.b32.xlu0 %v1319_v35, %s2160_s11  ;;  %1326 = vperm.xlu1 %1850, %v2551_v33   ;;  %v1353_v48 = vpop.permute.xlu1 %1352 }
 0x2df   : > { %v1355_v43 = vmul.f32 %v1353_v48, %v1215_v18 }
 0x2e0   : > { %v1424_v38 = vcombine.high %v1423_v36, %v1423_v36 }
 0x2e2   : > { %1426 = vst.msk [vmem:[#allocation3] sm:$0xf] %vm2609_vm8, %v1424_v38  ;;  %1347 = vrot.lane.b32.xlu0 %v1345_v40, %s2159_s9  ;;  %1311 = vrot.lane.b32.xlu1 %v1309_v41, %s2159_s9  ;;  %v1255_v33 = vpop.permute.xlu1 %1254  ;;  %s2044_s9 = scalar_lea.vmem %s2043_s12, 256 }
 0x2e3   : > { %v1257_v50 = vmul.f32 %v1255_v33, %v1213_v28  ;;  %v1685_v28 = vld [vmem:[%s2737_s5] ss:$0 sm:$0xff]  ;;  %p2046_p12 = scmp.lt.s32.totalorder %s2044_s9, %s2038_s27 }
 0x2e4   : > { %v1433_v32 = vmul.f32 %v1685_v28, %v2515_v7 }
 0x2e5   : > { %p2047_p13 = por %p2046_p12, %p2045_p11 }
 0x2e6   : > { %1337 = vrot.lane.b32.xlu1 %v1335_v42, %s2161_s3 }
 0x2e7   : > { %p2048_p0 = pnand %p2047_p13, %p2041_p5 }
 0x2ea   : > { %1357 = vrot.lane.b32.xlu1 %v1355_v43, %s2160_s11 }
 0x340   : > { %v1230_v8 = vpop.permute.xlu1 %1229  ;;  %v1240_v47 = vpop.permute.xlu0 %1239 }
 0x341   : > { %v1232_v46 = vadd.f32 %v1230_v8, %v1221_v45 }
 0x343   : > { %v1242_v14 = vadd.f32 %v1240_v47, %v1232_v46 }
 0x344   : > { %v1250_v49 = vpop.permute.xlu1 %1249 }
 0x345   : > { %v1252_v51 = vadd.f32 %v1250_v49, %v1242_v14 }
 0x347   : > { %v1258_v52 = vadd.f32 %v1257_v50, %v1252_v51 }
 0x348   : > { %v1266_v6 = vpop.permute.xlu1 %1265 }
 0x349   : > { %v1268_v11 = vadd.f32 %v1266_v6, %v1258_v52 }
 0x34c   : > { %v1276_v10 = vpop.permute.xlu1 %1275 }
 0x34d   : > { %v1291_v9 = vpop.permute.xlu0 %1290  ;;  %v1278_v39 = vadd.f32 %v1276_v10, %v1268_v11 }
 0x34e   : > { %v1293_v2 = vmul.f32 %v1291_v9, %v1214_v12 }
 0x351   : > { %v1286_v13 = vpop.permute.xlu0 %1285 }
 0x352   : > { %v1288_v15 = vadd.f32 %v1286_v13, %v1278_v39 }
 0x354   : > { %v1294_v17 = vadd.f32 %v1293_v2, %v1288_v15 }
 0x355   : > { %v1302_v19 = vpop.permute.xlu0 %1301 }
 0x356   : > { %v1304_v21 = vadd.f32 %v1302_v19, %v1294_v17 }
 0x359   : > { %v1327_v20 = vpop.permute.xlu1 %1326  ;;  %v1322_v24 = vpop.permute.xlu0 %1321 }
 0x35a   : > { %v1329_v25 = vmul.f32 %v1327_v20, %v1215_v18 }
 0x35d   : > { %v1312_v22 = vpop.permute.xlu1 %1311  ;;  %v1348_v54 = vpop.permute.xlu0 %1347 }
 0x35e   : > { %v1314_v23 = vadd.f32 %v1312_v22, %v1304_v21 }
 0x360   : > { %v1324_v27 = vadd.f32 %v1322_v24, %v1314_v23 }
 0x361   : > { %v1338_v29 = vpop.permute.xlu1 %1337 }
 0x362   : > { %v1330_v31 = vadd.f32 %v1329_v25, %v1324_v27 }
 0x364   : > { %v1340_v30 = vadd.f32 %v1338_v29, %v1330_v31 }
 0x365   : > { %v1358_v53 = vpop.permute.xlu1 %1357 }
 0x366   : > { %v1350_v57 = vadd.f32 %v1348_v54, %v1340_v30 }
 0x368   : > { %v1360_v56 = vadd.f32 %v1358_v53, %v1350_v57 }
 0x36a   : > { %v1434_v55 = vadd.f32 %v1433_v32, %v1360_v56 }
 0x36c   : > { %1435 = vst.msk [vmem:[%s478_s22] sm:$0xff] %vm685_vm3, %v1434_v55 }
 0x36d   : > { %2051 = shalt.err (!%p2048_p0)
}
 0x36e   : > { %s2052_s11 = scalar_lea.hbm %s1451_s16, 128  ;;  %s2056_s22 = scalar_lea.hbm %s2774_s13, 512 }
 0x36f   : > { %p2053_p2 = scmp.ne.s32.totalorder %s1451_s16, %s2052_s11  ;;  %p2057_p9 = scmp.lt.s32.totalorder %s1451_s16, %s2774_s13 }
 0x370   : > { %p2058_p8 = scmp.lt.s32.totalorder %s2056_s22, %s2052_s11 }
 0x371   : > { %p2054_p6 = pnand %p2053_p2, %p2302_p10 }
 0x372   : > { %p2059_p1 = por %p2058_p8, %p2057_p9 }
 0x373   : > { %p2055_p7 = pneg %p2054_p6 }
 0x375   : > { %p2060_p4 = pnand %p2059_p1, %p2055_p7 }
 0x377   : > { %2063 = shalt.err (!%p2060_p4)
}
 0x378   : > { %1703 = dma.vmem_to_hbm [thread:$0]  (%p2302_p10), %s1454_s7, 128, %s1451_s16, %s1437_s19  }
 0x379 PF: > { %s2775_s17 = sld [smem:[#allocation19_spill]]  ;;  %p1729_p3 = scmp.ge.s32.totalorder %s2146_s8, 2 }
 0x37a   : > { %s2776_s0 = sld [smem:[#allocation22_spill]] }
 0x37f   : > { %s1465_s20 = sand.u32 1, %s2775_s17  }
 0x380   : > { %p2777_p5 = scmp.ne.s32.totalorder %s2776_s0, 0  ;;  %s1466_s15 = scalar_lea.sflag [#allocation6], %s1465_s20 }
 0x382   : > { %p1723_p11 = pnand %p1729_p3, %p2777_p5 }
 0x384   : > { %p1724_p12 = pneg %p1723_p11 }
 0x386   : > { %2113 = dma.done.wait (%p1724_p12), %s1466_s15, 128  }
 0x387   : > { %2115 = vsyncadd (%p1724_p12), %s1466_s15, 4294967168  ;;  %s29_s8 = sadd.s32 1, %s2146_s8   ;;  %s2778_s18 = sld [smem:[#allocation25_spill]] }
 0x388   : > { %p26_p13 = scmp.ge.s32.totalorder %s29_s8, 6   ;;  %s2779_s27 = sld [smem:[#allocation20_spill]] }
 0x389   : > { %s2780_s28 = sld [smem:[#allocation21_spill]]  ;;  %s2783_s24 = smov %s2122_s25 }
 0x38a   : > { %s2781_s29 = sld [smem:[#allocation23_spill]]  ;;  %s2784_s25 = smov %s2126_s26 }
 0x38b   : > { %s2782_s30 = sld [smem:[#allocation24_spill]]  ;;  %28 = sbr.rel (!%p26_p13) target bundleno = 16 (0x10), region = 142 }
 0x38d   : > { %s2785_s26 = smov %s2778_s18 }
 0x390   :  { %1471 = vsyncpa [#allocation5], 1 }
 0x391   :  { %1473 = vsyncpa [#allocation5 + $0x1], 1 }
 0x392   :  { %1474 = vsyncpa [#allocation8], 1 }
 0x393   :  { %1476 = vsyncpa [#allocation8 + $0x1], 1 }
 0x394   :  { %1477 = vsyncpa [#allocation11], 1 }
 0x395   :  { %1479 = vsyncpa [#allocation11 + $0x1], 1 }
 0x396   :  { %1480 = vsyncpa [#allocation6], 1 }
 0x397   :  { %1482 = vsyncpa [#allocation6 + $0x1], 1 }

</bundles_post_ra>
